<compile_context>
chip_gen: v7x
topology: tpu7x:2x2x1
jax: 0.10.0
libtpu: 0.0.40
codegen_flags: <defaults>
</compile_context>

<pallas_src>
import functools

import jax
import jax.numpy as jnp
from jax.experimental import pallas as pl
from jax.experimental.pallas import tpu as pltpu

D_MODEL = 32          # small, consistent with the module (d_model)
NUM_HEADS = 8         # module default
DIM_FF = 2048         # PointWiseFeedForward default dim_feedforward (not overridden)
EPS = 1e-6            # custom LayerNorm eps
MAX_ROWS_PER_STEP = 1024   # cap on BT*L (FFN intermediate = rows x 2048 x 4 B f32)

# order of prepared (kernel-layout) parameters passed to pallas_call
PREP_ORDER = ("wqkv", "bqkv", "wo", "bo", "beta1", "gamma1",
              "w1", "b1", "w2", "b2", "beta2", "gamma2")


# ---------------------------------------------------------------------------
# Pallas kernel
# ---------------------------------------------------------------------------
def _layernorm(y, beta_ref, gamma_ref):
    # Matches the custom LayerNorm exactly:
    #   beta * (x - mean) / (std + eps) + gamma,  std = torch.std (unbiased, N-1)
    n = y.shape[-1]
    mean = jnp.mean(y, axis=-1, keepdims=True)
    var = jnp.sum((y - mean) ** 2, axis=-1, keepdims=True) * (1.0 / (n - 1))
    inv = pl.reciprocal(jnp.sqrt(var) + EPS, approx=True)     # EUP, not VALU divide
    return beta_ref[...] * (y - mean) * inv + gamma_ref[...]


def encoder_layer_kernel(num_heads,
                         x_ref,
                         wqkv_ref, bqkv_ref, wo_ref, bo_ref,
                         beta1_ref, gamma1_ref,
                         w1_ref, b1_ref, w2_ref, b2_ref,
                         beta2_ref, gamma2_ref,
                         o_ref):
    BT, L, D = x_ref.shape
    hd = D // num_heads
    scale = 1.0 / (float(hd) ** 0.5)

    x = x_ref[...].astype(jnp.float32)            # (BT, L, D)
    x2 = x.reshape(BT * L, D)                     # row-wise view; D stays on lanes

    # --- fused Q|K|V projection (one MXU push instead of three) -------------------
    qkv = jnp.dot(x2, wqkv_ref[...], preferred_element_type=jnp.float32) \
        + bqkv_ref[...]                           # (BT*L, 3D)
    qkv3 = qkv.reshape(BT, L, 3 * D)

    # --- multi-head attention with Wo folded into the head loop -------------------
    attn = jnp.zeros((BT, L, D), jnp.float32)
    for h in range(num_heads):                    # static unrolled loop over heads
        q_h = qkv3[:, :, h * hd:(h + 1) * hd]                     # (BT, L, hd)
        k_h = qkv3[:, :, D + h * hd:D + (h + 1) * hd]             # (BT, L, hd)
        v_h = qkv[:, 2 * D + h * hd:2 * D + (h + 1) * hd]         # (BT*L, hd)

        s = jnp.einsum("bqd,bkd->bqk", q_h, k_h,
                       preferred_element_type=jnp.float32) * scale   # (BT, L, L)
        s = s - jnp.max(s, axis=-1, keepdims=True)                   # stable softmax
        e = jnp.exp(s)
        p = e * pl.reciprocal(jnp.sum(e, axis=-1, keepdims=True), approx=True)

        # fold Wo: (v_h @ Wo[h]) so heads accumulate straight into (BT, L, D)
        vo = jnp.dot(v_h, wo_ref[h * hd:(h + 1) * hd, :],
                     preferred_element_type=jnp.float32)             # (BT*L, D)
        attn = attn + jnp.einsum("bqk,bkd->bqd", p, vo.reshape(BT, L, D),
                                 preferred_element_type=jnp.float32)

    attn2 = attn.reshape(BT * L, D) + bo_ref[...]                    # out_linear bias

    # --- residual + LayerNorm ------------------------------------------------------
    y = _layernorm(x2 + attn2, beta1_ref, gamma1_ref)

    # --- PointWiseFeedForward (bf16 MXU inputs, f32 accumulation) ------------------
    h1 = jnp.maximum(
        jnp.dot(y.astype(jnp.bfloat16), w1_ref[...],
                preferred_element_type=jnp.float32) + b1_ref[...], 0.0)   # ReLU
    h2 = jnp.dot(h1.astype(jnp.bfloat16), w2_ref[...],
                 preferred_element_type=jnp.float32) + b2_ref[...]
    z = _layernorm(y + h2, beta2_ref, gamma2_ref)

    o_ref[...] = z.reshape(BT, L, D).astype(o_ref.dtype)


# ---------------------------------------------------------------------------
# One-time parameter preparation (outside the per-call hot path)
# ---------------------------------------------------------------------------
def prepare_params(params):
    """Transpose PyTorch (out, in) weights to (in, out), fuse QKV, cast FFN to bf16."""
    return {
        "wqkv": jnp.concatenate(
            [params["wq"].T, params["wk"].T, params["wv"].T], axis=1),   # (D, 3D)
        "bqkv": jnp.concatenate(
            [params["bq"], params["bk"], params["bv"]], axis=1),         # (1, 3D)
        "wo": params["wo"].T,                                            # (D, D)
        "bo": params["bo"],
        "beta1": params["beta1"], "gamma1": params["gamma1"],
        "w1": params["w1"].T.astype(jnp.bfloat16),                       # (D, FF)
        "b1": params["b1"],
        "w2": params["w2"].T.astype(jnp.bfloat16),                       # (FF, D)
        "b2": params["b2"],
        "beta2": params["beta2"], "gamma2": params["gamma2"],
    }


def _pick_batch_tile(B, L):
    """Largest divisor of B with BT*L <= MAX_ROWS_PER_STEP (VMEM budget for the FFN)."""
    bt = max(1, min(B, MAX_ROWS_PER_STEP // max(L, 1)))
    while B % bt != 0:
        bt -= 1
    return bt


# ---------------------------------------------------------------------------
# Wrapper
# ---------------------------------------------------------------------------
def transformer_encoder_layer(x, prepared, num_heads=NUM_HEADS):
    B, L, D = x.shape
    bt = _pick_batch_tile(B, L)
    args = [prepared[name] for name in PREP_ORDER]

    def full_spec(p):
        nd = p.ndim
        return pl.BlockSpec(p.shape, lambda b: (0,) * nd)

    grid_spec = pltpu.PrefetchScalarGridSpec(
        num_scalar_prefetch=0,
        grid=(B // bt,),
        in_specs=[pl.BlockSpec((bt, L, D), lambda b: (b, 0, 0))]
                 + [full_spec(p) for p in args],
        out_specs=pl.BlockSpec((bt, L, D), lambda b: (b, 0, 0)),
    )
    return pl.pallas_call(
        functools.partial(encoder_layer_kernel, num_heads),
        out_shape=jax.ShapeDtypeStruct((B, L, D), x.dtype),
        grid_spec=grid_spec,
        compiler_params=pltpu.CompilerParams(
            dimension_semantics=("parallel",)),   # batch axis is fully independent
    )(x, *args)


# ---------------------------------------------------------------------------
# Deterministic parameter init (shapes from the module __init__, PyTorch layout)
# ---------------------------------------------------------------------------
def init_params(key):
    keys = iter(jax.random.split(key, 32))

    def rnd(shape, scale):
        return jax.random.normal(next(keys), shape, jnp.float32) * scale

    s_in = 1.0 / jnp.sqrt(jnp.float32(D_MODEL))
    s_ff = 1.0 / jnp.sqrt(jnp.float32(DIM_FF))
    p = {}
    p["wq"], p["bq"] = rnd((D_MODEL, D_MODEL), s_in), rnd((1, D_MODEL), 0.02)
    p["wk"], p["bk"] = rnd((D_MODEL, D_MODEL), s_in), rnd((1, D_MODEL), 0.02)
    p["wv"], p["bv"] = rnd((D_MODEL, D_MODEL), s_in), rnd((1, D_MODEL), 0.02)
    p["wo"], p["bo"] = rnd((D_MODEL, D_MODEL), s_in), rnd((1, D_MODEL), 0.02)
    # custom LayerNorm params (nn.Parameter of shape (d_model,)); randomized so the
    # layernorm math is actually exercised.
    p["beta1"], p["gamma1"] = rnd((1, D_MODEL), 1.0), rnd((1, D_MODEL), 1.0)
    p["w1"], p["b1"] = rnd((DIM_FF, D_MODEL), s_in), rnd((1, DIM_FF), 0.02)
    p["w2"], p["b2"] = rnd((D_MODEL, DIM_FF), s_ff), rnd((1, D_MODEL), 0.02)
    p["beta2"], p["gamma2"] = rnd((1, D_MODEL), 1.0), rnd((1, D_MODEL), 1.0)
    return p


# ---------------------------------------------------------------------------
# Pure-JAX f32 reference (mirrors the PyTorch forward) for a correctness check
# ---------------------------------------------------------------------------
def reference(x, params):
    def lin(a, w, b):
        return a @ w.T + b

    def ln(a, beta, gamma):
        m = a.mean(-1, keepdims=True)
        var = ((a - m) ** 2).sum(-1, keepdims=True) / (a.shape[-1] - 1)
        return beta * (a - m) / (jnp.sqrt(var) + EPS) + gamma

    B, L, D = x.shape
    H, hd = NUM_HEADS, D // NUM_HEADS
    q = lin(x, params["wq"], params["bq"]).reshape(B, L, H, hd).transpose(0, 2, 1, 3)
    k = lin(x, params["wk"], params["bk"]).reshape(B, L, H, hd).transpose(0, 2, 1, 3)
    v = lin(x, params["wv"], params["bv"]).reshape(B, L, H, hd).transpose(0, 2, 1, 3)
    s = jnp.einsum("bhqd,bhkd->bhqk", q, k) / jnp.sqrt(jnp.float32(hd))
    p = jax.nn.softmax(s, axis=-1)
    a = jnp.einsum("bhqk,bhkd->bhqd", p, v).transpose(0, 2, 1, 3).reshape(B, L, D)
    a = lin(a, params["wo"], params["bo"])
    y = ln(x + a, params["beta1"], params["gamma1"])
    h = jnp.maximum(lin(y, params["w1"], params["b1"]), 0.0)
    h = lin(h, params["w2"], params["b2"])
    return ln(y + h, params["beta2"], params["gamma2"])


if __name__ == "__main__":
    key = jax.random.PRNGKey(0)
    kx, kp = jax.random.split(key)

    B, L = 2, 8
    x = jax.random.normal(kx, (B, L, D_MODEL), jnp.float32)
    params = init_params(kp)
    prepared = prepare_params(params)     # one-time layout prep (transpose/fuse/bf16)

    out = transformer_encoder_layer(x, prepared)
    out = jax.block_until_ready(out)

    ref = jax.block_until_ready(reference(x, params))
    assert out.shape == (B, L, D_MODEL)
    # Tolerance slightly widened vs pure-f32: FFN matmuls use bf16 inputs and the
    # softmax/LayerNorm divides use approximate EUP reciprocals.
    assert jnp.allclose(out, ref, atol=3e-2, rtol=2e-2), (
        f"max abs err {jnp.max(jnp.abs(out - ref))}")

    print("KERNEL_OK")
</pallas_src>

<mosaic_0001>
module attributes {stable_mosaic.version = 11 : i64} {
  func.func @encoder_layer_kernel(%arg0: i32, %arg1: memref<2x8x32xf32, #tpu.memory_space<vmem>>, %arg2: memref<32x96xf32, #tpu.memory_space<vmem>>, %arg3: memref<1x96xf32, #tpu.memory_space<vmem>>, %arg4: memref<32x32xf32, #tpu.memory_space<vmem>>, %arg5: memref<1x32xf32, #tpu.memory_space<vmem>>, %arg6: memref<1x32xf32, #tpu.memory_space<vmem>>, %arg7: memref<1x32xf32, #tpu.memory_space<vmem>>, %arg8: memref<32x2048xbf16, #tpu.memory_space<vmem>>, %arg9: memref<1x2048xf32, #tpu.memory_space<vmem>>, %arg10: memref<2048x32xbf16, #tpu.memory_space<vmem>>, %arg11: memref<1x32xf32, #tpu.memory_space<vmem>>, %arg12: memref<1x32xf32, #tpu.memory_space<vmem>>, %arg13: memref<1x32xf32, #tpu.memory_space<vmem>>, %arg14: memref<2x8x32xf32, #tpu.memory_space<vmem>>) attributes {dimension_semantics = [#tpu.dimension_semantics<parallel>], iteration_bounds = array<i64: 1>, scalar_prefetch = 0 : i64, scratch_operands = 0 : i64, tpu.core_type = #tpu.core_type<tc>, window_params = [{transform_indices = @transform_0, window_bounds = array<i64: 2, 8, 32>}, {pipeline_mode = #tpu.pipeline_mode<synchronous>, transform_indices = @transform_1, window_bounds = array<i64: 32, 96>}, {pipeline_mode = #tpu.pipeline_mode<synchronous>, transform_indices = @transform_2, window_bounds = array<i64: 1, 96>}, {pipeline_mode = #tpu.pipeline_mode<synchronous>, transform_indices = @transform_3, window_bounds = array<i64: 32, 32>}, {pipeline_mode = #tpu.pipeline_mode<synchronous>, transform_indices = @transform_4, window_bounds = array<i64: 1, 32>}, {pipeline_mode = #tpu.pipeline_mode<synchronous>, transform_indices = @transform_5, window_bounds = array<i64: 1, 32>}, {pipeline_mode = #tpu.pipeline_mode<synchronous>, transform_indices = @transform_6, window_bounds = array<i64: 1, 32>}, {pipeline_mode = #tpu.pipeline_mode<synchronous>, transform_indices = @transform_7, window_bounds = array<i64: 32, 2048>}, {pipeline_mode = #tpu.pipeline_mode<synchronous>, transform_indices = @transform_8, window_bounds = array<i64: 1, 2048>}, {pipeline_mode = #tpu.pipeline_mode<synchronous>, transform_indices = @transform_9, window_bounds = array<i64: 2048, 32>}, {pipeline_mode = #tpu.pipeline_mode<synchronous>, transform_indices = @transform_10, window_bounds = array<i64: 1, 32>}, {pipeline_mode = #tpu.pipeline_mode<synchronous>, transform_indices = @transform_11, window_bounds = array<i64: 1, 32>}, {pipeline_mode = #tpu.pipeline_mode<synchronous>, transform_indices = @transform_12, window_bounds = array<i64: 1, 32>}, {transform_indices = @transform_13, window_bounds = array<i64: 2, 8, 32>}]} {
    %c0 = arith.constant 0 : index
    %c0_0 = arith.constant 0 : index
    %c0_1 = arith.constant 0 : index
    %0 = vector.load %arg1[%c0, %c0_0, %c0_1] : memref<2x8x32xf32, #tpu.memory_space<vmem>>, vector<2x8x32xf32>
    %1 = vector.shape_cast %0 : vector<2x8x32xf32> to vector<16x32xf32>
    %c0_2 = arith.constant 0 : index
    %c0_3 = arith.constant 0 : index
    %2 = vector.load %arg2[%c0_2, %c0_3] : memref<32x96xf32, #tpu.memory_space<vmem>>, vector<32x96xf32>
    %cst = arith.constant dense<0.000000e+00> : vector<16x96xf32>
    %3 = tpu.matmul %1, %2, %cst {dimension_numbers = #tpu.dot_dimension_numbers<[1], [0], [0], [1], [0, 0, 1, 1], [], []>} : vector<16x32xf32>, vector<32x96xf32>, vector<16x96xf32> -> vector<16x96xf32>
    %c0_4 = arith.constant 0 : index
    %c0_5 = arith.constant 0 : index
    %4 = vector.load %arg3[%c0_4, %c0_5] : memref<1x96xf32, #tpu.memory_space<vmem>>, vector<1x96xf32>
    %5 = vector.broadcast %4 : vector<1x96xf32> to vector<16x96xf32>
    %6 = arith.addf %3, %5 : vector<16x96xf32>
    %7 = vector.shape_cast %6 : vector<16x96xf32> to vector<2x8x96xf32>
    %cst_6 = arith.constant 0.000000e+00 : f32
    %8 = vector.broadcast %cst_6 : f32 to vector<2x8x32xf32>
    %9 = vector.extract_strided_slice %7 {offsets = [0, 0, 0], sizes = [2, 8, 4], strides = [1, 1, 1]} : vector<2x8x96xf32> to vector<2x8x4xf32>
    %10 = vector.extract_strided_slice %7 {offsets = [0, 0, 32], sizes = [2, 8, 4], strides = [1, 1, 1]} : vector<2x8x96xf32> to vector<2x8x4xf32>
    %11 = vector.extract_strided_slice %6 {offsets = [0, 64], sizes = [16, 4], strides = [1, 1]} : vector<16x96xf32> to vector<16x4xf32>
    "tpu.trace_start"() <{level = 10 : i32, message = "bqd,bkd->bqk"}> : () -> ()
    %cst_7 = arith.constant dense<0.000000e+00> : vector<2x8x8xf32>
    %12 = tpu.matmul %9, %10, %cst_7 {dimension_numbers = #tpu.dot_dimension_numbers<[2], [2], [1], [1], [0, 0, 0, 1, 1, 1], [0], [0]>} : vector<2x8x4xf32>, vector<2x8x4xf32>, vector<2x8x8xf32> -> vector<2x8x8xf32>
    "tpu.trace_stop"() : () -> ()
    %cst_8 = arith.constant 5.000000e-01 : f32
    %13 = vector.broadcast %cst_8 : f32 to vector<2x8x8xf32>
    %14 = arith.mulf %12, %13 : vector<2x8x8xf32>
    %cst_9 = arith.constant dense<0xFF800000> : vector<2x8xf32>
    %15 = vector.multi_reduction <maximumf>, %14, %cst_9 [2] : vector<2x8x8xf32> to vector<2x8xf32>
    %16 = vector.shape_cast %15 : vector<2x8xf32> to vector<2x8x1xf32>
    %17 = vector.broadcast %16 : vector<2x8x1xf32> to vector<2x8x8xf32>
    %18 = arith.subf %14, %17 : vector<2x8x8xf32>
    %19 = math.exp %18 : vector<2x8x8xf32>
    %cst_10 = arith.constant dense<0.000000e+00> : vector<2x8xf32>
    %20 = vector.multi_reduction <add>, %19, %cst_10 [2] : vector<2x8x8xf32> to vector<2x8xf32>
    %21 = vector.shape_cast %20 : vector<2x8xf32> to vector<2x8x1xf32>
    %22 = tpu.reciprocal %21 {approx = true} : vector<2x8x1xf32> -> vector<2x8x1xf32>
    %23 = vector.broadcast %22 : vector<2x8x1xf32> to vector<2x8x8xf32>
    %24 = arith.mulf %19, %23 : vector<2x8x8xf32>
    %c0_11 = arith.constant 0 : index
    %c0_12 = arith.constant 0 : index
    %25 = vector.load %arg4[%c0_11, %c0_12] : memref<32x32xf32, #tpu.memory_space<vmem>>, vector<4x32xf32>
    %cst_13 = arith.constant dense<0.000000e+00> : vector<16x32xf32>
    %26 = tpu.matmul %11, %25, %cst_13 {dimension_numbers = #tpu.dot_dimension_numbers<[1], [0], [0], [1], [0, 0, 1, 1], [], []>} : vector<16x4xf32>, vector<4x32xf32>, vector<16x32xf32> -> vector<16x32xf32>
    %27 = vector.shape_cast %26 : vector<16x32xf32> to vector<2x8x32xf32>
    "tpu.trace_start"() <{level = 10 : i32, message = "bqk,bkd->bqd"}> : () -> ()
    %cst_14 = arith.constant dense<0.000000e+00> : vector<2x8x32xf32>
    %28 = tpu.matmul %24, %27, %cst_14 {dimension_numbers = #tpu.dot_dimension_numbers<[2], [1], [1], [2], [0, 0, 0, 1, 1, 2], [0], [0]>} : vector<2x8x8xf32>, vector<2x8x32xf32>, vector<2x8x32xf32> -> vector<2x8x32xf32>
    "tpu.trace_stop"() : () -> ()
    %29 = arith.addf %8, %28 : vector<2x8x32xf32>
    %30 = vector.extract_strided_slice %7 {offsets = [0, 0, 4], sizes = [2, 8, 4], strides = [1, 1, 1]} : vector<2x8x96xf32> to vector<2x8x4xf32>
    %31 = vector.extract_strided_slice %7 {offsets = [0, 0, 36], sizes = [2, 8, 4], strides = [1, 1, 1]} : vector<2x8x96xf32> to vector<2x8x4xf32>
    %32 = vector.extract_strided_slice %6 {offsets = [0, 68], sizes = [16, 4], strides = [1, 1]} : vector<16x96xf32> to vector<16x4xf32>
    "tpu.trace_start"() <{level = 10 : i32, message = "bqd,bkd->bqk"}> : () -> ()
    %cst_15 = arith.constant dense<0.000000e+00> : vector<2x8x8xf32>
    %33 = tpu.matmul %30, %31, %cst_15 {dimension_numbers = #tpu.dot_dimension_numbers<[2], [2], [1], [1], [0, 0, 0, 1, 1, 1], [0], [0]>} : vector<2x8x4xf32>, vector<2x8x4xf32>, vector<2x8x8xf32> -> vector<2x8x8xf32>
    "tpu.trace_stop"() : () -> ()
    %cst_16 = arith.constant 5.000000e-01 : f32
    %34 = vector.broadcast %cst_16 : f32 to vector<2x8x8xf32>
    %35 = arith.mulf %33, %34 : vector<2x8x8xf32>
    %cst_17 = arith.constant dense<0xFF800000> : vector<2x8xf32>
    %36 = vector.multi_reduction <maximumf>, %35, %cst_17 [2] : vector<2x8x8xf32> to vector<2x8xf32>
    %37 = vector.shape_cast %36 : vector<2x8xf32> to vector<2x8x1xf32>
    %38 = vector.broadcast %37 : vector<2x8x1xf32> to vector<2x8x8xf32>
    %39 = arith.subf %35, %38 : vector<2x8x8xf32>
    %40 = math.exp %39 : vector<2x8x8xf32>
    %cst_18 = arith.constant dense<0.000000e+00> : vector<2x8xf32>
    %41 = vector.multi_reduction <add>, %40, %cst_18 [2] : vector<2x8x8xf32> to vector<2x8xf32>
    %42 = vector.shape_cast %41 : vector<2x8xf32> to vector<2x8x1xf32>
    %43 = tpu.reciprocal %42 {approx = true} : vector<2x8x1xf32> -> vector<2x8x1xf32>
    %44 = vector.broadcast %43 : vector<2x8x1xf32> to vector<2x8x8xf32>
    %45 = arith.mulf %40, %44 : vector<2x8x8xf32>
    %c4 = arith.constant 4 : index
    %c0_19 = arith.constant 0 : index
    %46 = vector.load %arg4[%c4, %c0_19] : memref<32x32xf32, #tpu.memory_space<vmem>>, vector<4x32xf32>
    %cst_20 = arith.constant dense<0.000000e+00> : vector<16x32xf32>
    %47 = tpu.matmul %32, %46, %cst_20 {dimension_numbers = #tpu.dot_dimension_numbers<[1], [0], [0], [1], [0, 0, 1, 1], [], []>} : vector<16x4xf32>, vector<4x32xf32>, vector<16x32xf32> -> vector<16x32xf32>
    %48 = vector.shape_cast %47 : vector<16x32xf32> to vector<2x8x32xf32>
    "tpu.trace_start"() <{level = 10 : i32, message = "bqk,bkd->bqd"}> : () -> ()
    %cst_21 = arith.constant dense<0.000000e+00> : vector<2x8x32xf32>
    %49 = tpu.matmul %45, %48, %cst_21 {dimension_numbers = #tpu.dot_dimension_numbers<[2], [1], [1], [2], [0, 0, 0, 1, 1, 2], [0], [0]>} : vector<2x8x8xf32>, vector<2x8x32xf32>, vector<2x8x32xf32> -> vector<2x8x32xf32>
    "tpu.trace_stop"() : () -> ()
    %50 = arith.addf %29, %49 : vector<2x8x32xf32>
    %51 = vector.extract_strided_slice %7 {offsets = [0, 0, 8], sizes = [2, 8, 4], strides = [1, 1, 1]} : vector<2x8x96xf32> to vector<2x8x4xf32>
    %52 = vector.extract_strided_slice %7 {offsets = [0, 0, 40], sizes = [2, 8, 4], strides = [1, 1, 1]} : vector<2x8x96xf32> to vector<2x8x4xf32>
    %53 = vector.extract_strided_slice %6 {offsets = [0, 72], sizes = [16, 4], strides = [1, 1]} : vector<16x96xf32> to vector<16x4xf32>
    "tpu.trace_start"() <{level = 10 : i32, message = "bqd,bkd->bqk"}> : () -> ()
    %cst_22 = arith.constant dense<0.000000e+00> : vector<2x8x8xf32>
    %54 = tpu.matmul %51, %52, %cst_22 {dimension_numbers = #tpu.dot_dimension_numbers<[2], [2], [1], [1], [0, 0, 0, 1, 1, 1], [0], [0]>} : vector<2x8x4xf32>, vector<2x8x4xf32>, vector<2x8x8xf32> -> vector<2x8x8xf32>
    "tpu.trace_stop"() : () -> ()
    %cst_23 = arith.constant 5.000000e-01 : f32
    %55 = vector.broadcast %cst_23 : f32 to vector<2x8x8xf32>
    %56 = arith.mulf %54, %55 : vector<2x8x8xf32>
    %cst_24 = arith.constant dense<0xFF800000> : vector<2x8xf32>
    %57 = vector.multi_reduction <maximumf>, %56, %cst_24 [2] : vector<2x8x8xf32> to vector<2x8xf32>
    %58 = vector.shape_cast %57 : vector<2x8xf32> to vector<2x8x1xf32>
    %59 = vector.broadcast %58 : vector<2x8x1xf32> to vector<2x8x8xf32>
    %60 = arith.subf %56, %59 : vector<2x8x8xf32>
    %61 = math.exp %60 : vector<2x8x8xf32>
    %cst_25 = arith.constant dense<0.000000e+00> : vector<2x8xf32>
    %62 = vector.multi_reduction <add>, %61, %cst_25 [2] : vector<2x8x8xf32> to vector<2x8xf32>
    %63 = vector.shape_cast %62 : vector<2x8xf32> to vector<2x8x1xf32>
    %64 = tpu.reciprocal %63 {approx = true} : vector<2x8x1xf32> -> vector<2x8x1xf32>
    %65 = vector.broadcast %64 : vector<2x8x1xf32> to vector<2x8x8xf32>
    %66 = arith.mulf %61, %65 : vector<2x8x8xf32>
    %c8 = arith.constant 8 : index
    %c0_26 = arith.constant 0 : index
    %67 = vector.load %arg4[%c8, %c0_26] : memref<32x32xf32, #tpu.memory_space<vmem>>, vector<4x32xf32>
    %cst_27 = arith.constant dense<0.000000e+00> : vector<16x32xf32>
    %68 = tpu.matmul %53, %67, %cst_27 {dimension_numbers = #tpu.dot_dimension_numbers<[1], [0], [0], [1], [0, 0, 1, 1], [], []>} : vector<16x4xf32>, vector<4x32xf32>, vector<16x32xf32> -> vector<16x32xf32>
    %69 = vector.shape_cast %68 : vector<16x32xf32> to vector<2x8x32xf32>
    "tpu.trace_start"() <{level = 10 : i32, message = "bqk,bkd->bqd"}> : () -> ()
    %cst_28 = arith.constant dense<0.000000e+00> : vector<2x8x32xf32>
    %70 = tpu.matmul %66, %69, %cst_28 {dimension_numbers = #tpu.dot_dimension_numbers<[2], [1], [1], [2], [0, 0, 0, 1, 1, 2], [0], [0]>} : vector<2x8x8xf32>, vector<2x8x32xf32>, vector<2x8x32xf32> -> vector<2x8x32xf32>
    "tpu.trace_stop"() : () -> ()
    %71 = arith.addf %50, %70 : vector<2x8x32xf32>
    %72 = vector.extract_strided_slice %7 {offsets = [0, 0, 12], sizes = [2, 8, 4], strides = [1, 1, 1]} : vector<2x8x96xf32> to vector<2x8x4xf32>
    %73 = vector.extract_strided_slice %7 {offsets = [0, 0, 44], sizes = [2, 8, 4], strides = [1, 1, 1]} : vector<2x8x96xf32> to vector<2x8x4xf32>
    %74 = vector.extract_strided_slice %6 {offsets = [0, 76], sizes = [16, 4], strides = [1, 1]} : vector<16x96xf32> to vector<16x4xf32>
    "tpu.trace_start"() <{level = 10 : i32, message = "bqd,bkd->bqk"}> : () -> ()
    %cst_29 = arith.constant dense<0.000000e+00> : vector<2x8x8xf32>
    %75 = tpu.matmul %72, %73, %cst_29 {dimension_numbers = #tpu.dot_dimension_numbers<[2], [2], [1], [1], [0, 0, 0, 1, 1, 1], [0], [0]>} : vector<2x8x4xf32>, vector<2x8x4xf32>, vector<2x8x8xf32> -> vector<2x8x8xf32>
    "tpu.trace_stop"() : () -> ()
    %cst_30 = arith.constant 5.000000e-01 : f32
    %76 = vector.broadcast %cst_30 : f32 to vector<2x8x8xf32>
    %77 = arith.mulf %75, %76 : vector<2x8x8xf32>
    %cst_31 = arith.constant dense<0xFF800000> : vector<2x8xf32>
    %78 = vector.multi_reduction <maximumf>, %77, %cst_31 [2] : vector<2x8x8xf32> to vector<2x8xf32>
    %79 = vector.shape_cast %78 : vector<2x8xf32> to vector<2x8x1xf32>
    %80 = vector.broadcast %79 : vector<2x8x1xf32> to vector<2x8x8xf32>
    %81 = arith.subf %77, %80 : vector<2x8x8xf32>
    %82 = math.exp %81 : vector<2x8x8xf32>
    %cst_32 = arith.constant dense<0.000000e+00> : vector<2x8xf32>
    %83 = vector.multi_reduction <add>, %82, %cst_32 [2] : vector<2x8x8xf32> to vector<2x8xf32>
    %84 = vector.shape_cast %83 : vector<2x8xf32> to vector<2x8x1xf32>
    %85 = tpu.reciprocal %84 {approx = true} : vector<2x8x1xf32> -> vector<2x8x1xf32>
    %86 = vector.broadcast %85 : vector<2x8x1xf32> to vector<2x8x8xf32>
    %87 = arith.mulf %82, %86 : vector<2x8x8xf32>
    %c12 = arith.constant 12 : index
    %c0_33 = arith.constant 0 : index
    %88 = vector.load %arg4[%c12, %c0_33] : memref<32x32xf32, #tpu.memory_space<vmem>>, vector<4x32xf32>
    %cst_34 = arith.constant dense<0.000000e+00> : vector<16x32xf32>
    %89 = tpu.matmul %74, %88, %cst_34 {dimension_numbers = #tpu.dot_dimension_numbers<[1], [0], [0], [1], [0, 0, 1, 1], [], []>} : vector<16x4xf32>, vector<4x32xf32>, vector<16x32xf32> -> vector<16x32xf32>
    %90 = vector.shape_cast %89 : vector<16x32xf32> to vector<2x8x32xf32>
    "tpu.trace_start"() <{level = 10 : i32, message = "bqk,bkd->bqd"}> : () -> ()
    %cst_35 = arith.constant dense<0.000000e+00> : vector<2x8x32xf32>
    %91 = tpu.matmul %87, %90, %cst_35 {dimension_numbers = #tpu.dot_dimension_numbers<[2], [1], [1], [2], [0, 0, 0, 1, 1, 2], [0], [0]>} : vector<2x8x8xf32>, vector<2x8x32xf32>, vector<2x8x32xf32> -> vector<2x8x32xf32>
    "tpu.trace_stop"() : () -> ()
    %92 = arith.addf %71, %91 : vector<2x8x32xf32>
    %93 = vector.extract_strided_slice %7 {offsets = [0, 0, 16], sizes = [2, 8, 4], strides = [1, 1, 1]} : vector<2x8x96xf32> to vector<2x8x4xf32>
    %94 = vector.extract_strided_slice %7 {offsets = [0, 0, 48], sizes = [2, 8, 4], strides = [1, 1, 1]} : vector<2x8x96xf32> to vector<2x8x4xf32>
    %95 = vector.extract_strided_slice %6 {offsets = [0, 80], sizes = [16, 4], strides = [1, 1]} : vector<16x96xf32> to vector<16x4xf32>
    "tpu.trace_start"() <{level = 10 : i32, message = "bqd,bkd->bqk"}> : () -> ()
    %cst_36 = arith.constant dense<0.000000e+00> : vector<2x8x8xf32>
    %96 = tpu.matmul %93, %94, %cst_36 {dimension_numbers = #tpu.dot_dimension_numbers<[2], [2], [1], [1], [0, 0, 0, 1, 1, 1], [0], [0]>} : vector<2x8x4xf32>, vector<2x8x4xf32>, vector<2x8x8xf32> -> vector<2x8x8xf32>
    "tpu.trace_stop"() : () -> ()
    %cst_37 = arith.constant 5.000000e-01 : f32
    %97 = vector.broadcast %cst_37 : f32 to vector<2x8x8xf32>
    %98 = arith.mulf %96, %97 : vector<2x8x8xf32>
    %cst_38 = arith.constant dense<0xFF800000> : vector<2x8xf32>
    %99 = vector.multi_reduction <maximumf>, %98, %cst_38 [2] : vector<2x8x8xf32> to vector<2x8xf32>
    %100 = vector.shape_cast %99 : vector<2x8xf32> to vector<2x8x1xf32>
    %101 = vector.broadcast %100 : vector<2x8x1xf32> to vector<2x8x8xf32>
    %102 = arith.subf %98, %101 : vector<2x8x8xf32>
    %103 = math.exp %102 : vector<2x8x8xf32>
    %cst_39 = arith.constant dense<0.000000e+00> : vector<2x8xf32>
    %104 = vector.multi_reduction <add>, %103, %cst_39 [2] : vector<2x8x8xf32> to vector<2x8xf32>
    %105 = vector.shape_cast %104 : vector<2x8xf32> to vector<2x8x1xf32>
    %106 = tpu.reciprocal %105 {approx = true} : vector<2x8x1xf32> -> vector<2x8x1xf32>
    %107 = vector.broadcast %106 : vector<2x8x1xf32> to vector<2x8x8xf32>
    %108 = arith.mulf %103, %107 : vector<2x8x8xf32>
    %c16 = arith.constant 16 : index
    %c0_40 = arith.constant 0 : index
    %109 = vector.load %arg4[%c16, %c0_40] : memref<32x32xf32, #tpu.memory_space<vmem>>, vector<4x32xf32>
    %cst_41 = arith.constant dense<0.000000e+00> : vector<16x32xf32>
    %110 = tpu.matmul %95, %109, %cst_41 {dimension_numbers = #tpu.dot_dimension_numbers<[1], [0], [0], [1], [0, 0, 1, 1], [], []>} : vector<16x4xf32>, vector<4x32xf32>, vector<16x32xf32> -> vector<16x32xf32>
    %111 = vector.shape_cast %110 : vector<16x32xf32> to vector<2x8x32xf32>
    "tpu.trace_start"() <{level = 10 : i32, message = "bqk,bkd->bqd"}> : () -> ()
    %cst_42 = arith.constant dense<0.000000e+00> : vector<2x8x32xf32>
    %112 = tpu.matmul %108, %111, %cst_42 {dimension_numbers = #tpu.dot_dimension_numbers<[2], [1], [1], [2], [0, 0, 0, 1, 1, 2], [0], [0]>} : vector<2x8x8xf32>, vector<2x8x32xf32>, vector<2x8x32xf32> -> vector<2x8x32xf32>
    "tpu.trace_stop"() : () -> ()
    %113 = arith.addf %92, %112 : vector<2x8x32xf32>
    %114 = vector.extract_strided_slice %7 {offsets = [0, 0, 20], sizes = [2, 8, 4], strides = [1, 1, 1]} : vector<2x8x96xf32> to vector<2x8x4xf32>
    %115 = vector.extract_strided_slice %7 {offsets = [0, 0, 52], sizes = [2, 8, 4], strides = [1, 1, 1]} : vector<2x8x96xf32> to vector<2x8x4xf32>
    %116 = vector.extract_strided_slice %6 {offsets = [0, 84], sizes = [16, 4], strides = [1, 1]} : vector<16x96xf32> to vector<16x4xf32>
    "tpu.trace_start"() <{level = 10 : i32, message = "bqd,bkd->bqk"}> : () -> ()
    %cst_43 = arith.constant dense<0.000000e+00> : vector<2x8x8xf32>
    %117 = tpu.matmul %114, %115, %cst_43 {dimension_numbers = #tpu.dot_dimension_numbers<[2], [2], [1], [1], [0, 0, 0, 1, 1, 1], [0], [0]>} : vector<2x8x4xf32>, vector<2x8x4xf32>, vector<2x8x8xf32> -> vector<2x8x8xf32>
    "tpu.trace_stop"() : () -> ()
    %cst_44 = arith.constant 5.000000e-01 : f32
    %118 = vector.broadcast %cst_44 : f32 to vector<2x8x8xf32>
    %119 = arith.mulf %117, %118 : vector<2x8x8xf32>
    %cst_45 = arith.constant dense<0xFF800000> : vector<2x8xf32>
    %120 = vector.multi_reduction <maximumf>, %119, %cst_45 [2] : vector<2x8x8xf32> to vector<2x8xf32>
    %121 = vector.shape_cast %120 : vector<2x8xf32> to vector<2x8x1xf32>
    %122 = vector.broadcast %121 : vector<2x8x1xf32> to vector<2x8x8xf32>
    %123 = arith.subf %119, %122 : vector<2x8x8xf32>
    %124 = math.exp %123 : vector<2x8x8xf32>
    %cst_46 = arith.constant dense<0.000000e+00> : vector<2x8xf32>
    %125 = vector.multi_reduction <add>, %124, %cst_46 [2] : vector<2x8x8xf32> to vector<2x8xf32>
    %126 = vector.shape_cast %125 : vector<2x8xf32> to vector<2x8x1xf32>
    %127 = tpu.reciprocal %126 {approx = true} : vector<2x8x1xf32> -> vector<2x8x1xf32>
    %128 = vector.broadcast %127 : vector<2x8x1xf32> to vector<2x8x8xf32>
    %129 = arith.mulf %124, %128 : vector<2x8x8xf32>
    %c20 = arith.constant 20 : index
    %c0_47 = arith.constant 0 : index
    %130 = vector.load %arg4[%c20, %c0_47] : memref<32x32xf32, #tpu.memory_space<vmem>>, vector<4x32xf32>
    %cst_48 = arith.constant dense<0.000000e+00> : vector<16x32xf32>
    %131 = tpu.matmul %116, %130, %cst_48 {dimension_numbers = #tpu.dot_dimension_numbers<[1], [0], [0], [1], [0, 0, 1, 1], [], []>} : vector<16x4xf32>, vector<4x32xf32>, vector<16x32xf32> -> vector<16x32xf32>
    %132 = vector.shape_cast %131 : vector<16x32xf32> to vector<2x8x32xf32>
    "tpu.trace_start"() <{level = 10 : i32, message = "bqk,bkd->bqd"}> : () -> ()
    %cst_49 = arith.constant dense<0.000000e+00> : vector<2x8x32xf32>
    %133 = tpu.matmul %129, %132, %cst_49 {dimension_numbers = #tpu.dot_dimension_numbers<[2], [1], [1], [2], [0, 0, 0, 1, 1, 2], [0], [0]>} : vector<2x8x8xf32>, vector<2x8x32xf32>, vector<2x8x32xf32> -> vector<2x8x32xf32>
    "tpu.trace_stop"() : () -> ()
    %134 = arith.addf %113, %133 : vector<2x8x32xf32>
    %135 = vector.extract_strided_slice %7 {offsets = [0, 0, 24], sizes = [2, 8, 4], strides = [1, 1, 1]} : vector<2x8x96xf32> to vector<2x8x4xf32>
    %136 = vector.extract_strided_slice %7 {offsets = [0, 0, 56], sizes = [2, 8, 4], strides = [1, 1, 1]} : vector<2x8x96xf32> to vector<2x8x4xf32>
    %137 = vector.extract_strided_slice %6 {offsets = [0, 88], sizes = [16, 4], strides = [1, 1]} : vector<16x96xf32> to vector<16x4xf32>
    "tpu.trace_start"() <{level = 10 : i32, message = "bqd,bkd->bqk"}> : () -> ()
    %cst_50 = arith.constant dense<0.000000e+00> : vector<2x8x8xf32>
    %138 = tpu.matmul %135, %136, %cst_50 {dimension_numbers = #tpu.dot_dimension_numbers<[2], [2], [1], [1], [0, 0, 0, 1, 1, 1], [0], [0]>} : vector<2x8x4xf32>, vector<2x8x4xf32>, vector<2x8x8xf32> -> vector<2x8x8xf32>
    "tpu.trace_stop"() : () -> ()
    %cst_51 = arith.constant 5.000000e-01 : f32
    %139 = vector.broadcast %cst_51 : f32 to vector<2x8x8xf32>
    %140 = arith.mulf %138, %139 : vector<2x8x8xf32>
    %cst_52 = arith.constant dense<0xFF800000> : vector<2x8xf32>
    %141 = vector.multi_reduction <maximumf>, %140, %cst_52 [2] : vector<2x8x8xf32> to vector<2x8xf32>
    %142 = vector.shape_cast %141 : vector<2x8xf32> to vector<2x8x1xf32>
    %143 = vector.broadcast %142 : vector<2x8x1xf32> to vector<2x8x8xf32>
    %144 = arith.subf %140, %143 : vector<2x8x8xf32>
    %145 = math.exp %144 : vector<2x8x8xf32>
    %cst_53 = arith.constant dense<0.000000e+00> : vector<2x8xf32>
    %146 = vector.multi_reduction <add>, %145, %cst_53 [2] : vector<2x8x8xf32> to vector<2x8xf32>
    %147 = vector.shape_cast %146 : vector<2x8xf32> to vector<2x8x1xf32>
    %148 = tpu.reciprocal %147 {approx = true} : vector<2x8x1xf32> -> vector<2x8x1xf32>
    %149 = vector.broadcast %148 : vector<2x8x1xf32> to vector<2x8x8xf32>
    %150 = arith.mulf %145, %149 : vector<2x8x8xf32>
    %c24 = arith.constant 24 : index
    %c0_54 = arith.constant 0 : index
    %151 = vector.load %arg4[%c24, %c0_54] : memref<32x32xf32, #tpu.memory_space<vmem>>, vector<4x32xf32>
    %cst_55 = arith.constant dense<0.000000e+00> : vector<16x32xf32>
    %152 = tpu.matmul %137, %151, %cst_55 {dimension_numbers = #tpu.dot_dimension_numbers<[1], [0], [0], [1], [0, 0, 1, 1], [], []>} : vector<16x4xf32>, vector<4x32xf32>, vector<16x32xf32> -> vector<16x32xf32>
    %153 = vector.shape_cast %152 : vector<16x32xf32> to vector<2x8x32xf32>
    "tpu.trace_start"() <{level = 10 : i32, message = "bqk,bkd->bqd"}> : () -> ()
    %cst_56 = arith.constant dense<0.000000e+00> : vector<2x8x32xf32>
    %154 = tpu.matmul %150, %153, %cst_56 {dimension_numbers = #tpu.dot_dimension_numbers<[2], [1], [1], [2], [0, 0, 0, 1, 1, 2], [0], [0]>} : vector<2x8x8xf32>, vector<2x8x32xf32>, vector<2x8x32xf32> -> vector<2x8x32xf32>
    "tpu.trace_stop"() : () -> ()
    %155 = arith.addf %134, %154 : vector<2x8x32xf32>
    %156 = vector.extract_strided_slice %7 {offsets = [0, 0, 28], sizes = [2, 8, 4], strides = [1, 1, 1]} : vector<2x8x96xf32> to vector<2x8x4xf32>
    %157 = vector.extract_strided_slice %7 {offsets = [0, 0, 60], sizes = [2, 8, 4], strides = [1, 1, 1]} : vector<2x8x96xf32> to vector<2x8x4xf32>
    %158 = vector.extract_strided_slice %6 {offsets = [0, 92], sizes = [16, 4], strides = [1, 1]} : vector<16x96xf32> to vector<16x4xf32>
    "tpu.trace_start"() <{level = 10 : i32, message = "bqd,bkd->bqk"}> : () -> ()
    %cst_57 = arith.constant dense<0.000000e+00> : vector<2x8x8xf32>
    %159 = tpu.matmul %156, %157, %cst_57 {dimension_numbers = #tpu.dot_dimension_numbers<[2], [2], [1], [1], [0, 0, 0, 1, 1, 1], [0], [0]>} : vector<2x8x4xf32>, vector<2x8x4xf32>, vector<2x8x8xf32> -> vector<2x8x8xf32>
    "tpu.trace_stop"() : () -> ()
    %cst_58 = arith.constant 5.000000e-01 : f32
    %160 = vector.broadcast %cst_58 : f32 to vector<2x8x8xf32>
    %161 = arith.mulf %159, %160 : vector<2x8x8xf32>
    %cst_59 = arith.constant dense<0xFF800000> : vector<2x8xf32>
    %162 = vector.multi_reduction <maximumf>, %161, %cst_59 [2] : vector<2x8x8xf32> to vector<2x8xf32>
    %163 = vector.shape_cast %162 : vector<2x8xf32> to vector<2x8x1xf32>
    %164 = vector.broadcast %163 : vector<2x8x1xf32> to vector<2x8x8xf32>
    %165 = arith.subf %161, %164 : vector<2x8x8xf32>
    %166 = math.exp %165 : vector<2x8x8xf32>
    %cst_60 = arith.constant dense<0.000000e+00> : vector<2x8xf32>
    %167 = vector.multi_reduction <add>, %166, %cst_60 [2] : vector<2x8x8xf32> to vector<2x8xf32>
    %168 = vector.shape_cast %167 : vector<2x8xf32> to vector<2x8x1xf32>
    %169 = tpu.reciprocal %168 {approx = true} : vector<2x8x1xf32> -> vector<2x8x1xf32>
    %170 = vector.broadcast %169 : vector<2x8x1xf32> to vector<2x8x8xf32>
    %171 = arith.mulf %166, %170 : vector<2x8x8xf32>
    %c28 = arith.constant 28 : index
    %c0_61 = arith.constant 0 : index
    %172 = vector.load %arg4[%c28, %c0_61] : memref<32x32xf32, #tpu.memory_space<vmem>>, vector<4x32xf32>
    %cst_62 = arith.constant dense<0.000000e+00> : vector<16x32xf32>
    %173 = tpu.matmul %158, %172, %cst_62 {dimension_numbers = #tpu.dot_dimension_numbers<[1], [0], [0], [1], [0, 0, 1, 1], [], []>} : vector<16x4xf32>, vector<4x32xf32>, vector<16x32xf32> -> vector<16x32xf32>
    %174 = vector.shape_cast %173 : vector<16x32xf32> to vector<2x8x32xf32>
    "tpu.trace_start"() <{level = 10 : i32, message = "bqk,bkd->bqd"}> : () -> ()
    %cst_63 = arith.constant dense<0.000000e+00> : vector<2x8x32xf32>
    %175 = tpu.matmul %171, %174, %cst_63 {dimension_numbers = #tpu.dot_dimension_numbers<[2], [1], [1], [2], [0, 0, 0, 1, 1, 2], [0], [0]>} : vector<2x8x8xf32>, vector<2x8x32xf32>, vector<2x8x32xf32> -> vector<2x8x32xf32>
    "tpu.trace_stop"() : () -> ()
    %176 = arith.addf %155, %175 : vector<2x8x32xf32>
    %177 = vector.shape_cast %176 : vector<2x8x32xf32> to vector<16x32xf32>
    %c0_64 = arith.constant 0 : index
    %c0_65 = arith.constant 0 : index
    %178 = vector.load %arg5[%c0_64, %c0_65] : memref<1x32xf32, #tpu.memory_space<vmem>>, vector<1x32xf32>
    %179 = vector.broadcast %178 : vector<1x32xf32> to vector<16x32xf32>
    %180 = arith.addf %177, %179 : vector<16x32xf32>
    %181 = arith.addf %1, %180 : vector<16x32xf32>
    %cst_66 = arith.constant dense<0.000000e+00> : vector<16xf32>
    %182 = vector.multi_reduction <add>, %181, %cst_66 [1] : vector<16x32xf32> to vector<16xf32>
    %183 = vector.shape_cast %182 : vector<16xf32> to vector<16x1xf32>
    %cst_67 = arith.constant 3.200000e+01 : f32
    %184 = vector.broadcast %cst_67 : f32 to vector<16x1xf32>
    %185 = arith.divf %183, %184 : vector<16x1xf32>
    %186 = vector.broadcast %185 : vector<16x1xf32> to vector<16x32xf32>
    %187 = arith.subf %181, %186 : vector<16x32xf32>
    %188 = arith.mulf %187, %187 : vector<16x32xf32>
    %cst_68 = arith.constant dense<0.000000e+00> : vector<16xf32>
    %189 = vector.multi_reduction <add>, %188, %cst_68 [1] : vector<16x32xf32> to vector<16xf32>
    %190 = vector.shape_cast %189 : vector<16xf32> to vector<16x1xf32>
    %cst_69 = arith.constant 0.0322580636 : f32
    %191 = vector.broadcast %cst_69 : f32 to vector<16x1xf32>
    %192 = arith.mulf %190, %191 : vector<16x1xf32>
    %193 = math.sqrt %192 : vector<16x1xf32>
    %cst_70 = arith.constant 9.99999997E-7 : f32
    %194 = vector.broadcast %cst_70 : f32 to vector<16x1xf32>
    %195 = arith.addf %193, %194 : vector<16x1xf32>
    %196 = tpu.reciprocal %195 {approx = true} : vector<16x1xf32> -> vector<16x1xf32>
    %c0_71 = arith.constant 0 : index
    %c0_72 = arith.constant 0 : index
    %197 = vector.load %arg6[%c0_71, %c0_72] : memref<1x32xf32, #tpu.memory_space<vmem>>, vector<1x32xf32>
    %198 = vector.broadcast %185 : vector<16x1xf32> to vector<16x32xf32>
    %199 = arith.subf %181, %198 : vector<16x32xf32>
    %200 = vector.broadcast %197 : vector<1x32xf32> to vector<16x32xf32>
    %201 = arith.mulf %200, %199 : vector<16x32xf32>
    %202 = vector.broadcast %196 : vector<16x1xf32> to vector<16x32xf32>
    %203 = arith.mulf %201, %202 : vector<16x32xf32>
    %c0_73 = arith.constant 0 : index
    %c0_74 = arith.constant 0 : index
    %204 = vector.load %arg7[%c0_73, %c0_74] : memref<1x32xf32, #tpu.memory_space<vmem>>, vector<1x32xf32>
    %205 = vector.broadcast %204 : vector<1x32xf32> to vector<16x32xf32>
    %206 = arith.addf %203, %205 : vector<16x32xf32>
    %207 = arith.truncf %206 : vector<16x32xf32> to vector<16x32xbf16>
    %c0_75 = arith.constant 0 : index
    %c0_76 = arith.constant 0 : index
    %208 = vector.load %arg8[%c0_75, %c0_76] : memref<32x2048xbf16, #tpu.memory_space<vmem>>, vector<32x2048xbf16>
    %cst_77 = arith.constant dense<0.000000e+00> : vector<16x2048xf32>
    %209 = tpu.matmul %207, %208, %cst_77 {dimension_numbers = #tpu.dot_dimension_numbers<[1], [0], [0], [1], [0, 0, 1, 1], [], []>} : vector<16x32xbf16>, vector<32x2048xbf16>, vector<16x2048xf32> -> vector<16x2048xf32>
    %c0_78 = arith.constant 0 : index
    %c0_79 = arith.constant 0 : index
    %210 = vector.load %arg9[%c0_78, %c0_79] : memref<1x2048xf32, #tpu.memory_space<vmem>>, vector<1x2048xf32>
    %211 = vector.broadcast %210 : vector<1x2048xf32> to vector<16x2048xf32>
    %212 = arith.addf %209, %211 : vector<16x2048xf32>
    %cst_80 = arith.constant 0.000000e+00 : f32
    %213 = vector.broadcast %cst_80 : f32 to vector<16x2048xf32>
    %214 = arith.maximumf %212, %213 : vector<16x2048xf32>
    %215 = arith.truncf %214 : vector<16x2048xf32> to vector<16x2048xbf16>
    %c0_81 = arith.constant 0 : index
    %c0_82 = arith.constant 0 : index
    %216 = vector.load %arg10[%c0_81, %c0_82] : memref<2048x32xbf16, #tpu.memory_space<vmem>>, vector<2048x32xbf16>
    %cst_83 = arith.constant dense<0.000000e+00> : vector<16x32xf32>
    %217 = tpu.matmul %215, %216, %cst_83 {dimension_numbers = #tpu.dot_dimension_numbers<[1], [0], [0], [1], [0, 0, 1, 1], [], []>} : vector<16x2048xbf16>, vector<2048x32xbf16>, vector<16x32xf32> -> vector<16x32xf32>
    %c0_84 = arith.constant 0 : index
    %c0_85 = arith.constant 0 : index
    %218 = vector.load %arg11[%c0_84, %c0_85] : memref<1x32xf32, #tpu.memory_space<vmem>>, vector<1x32xf32>
    %219 = vector.broadcast %218 : vector<1x32xf32> to vector<16x32xf32>
    %220 = arith.addf %217, %219 : vector<16x32xf32>
    %221 = arith.addf %206, %220 : vector<16x32xf32>
    %cst_86 = arith.constant dense<0.000000e+00> : vector<16xf32>
    %222 = vector.multi_reduction <add>, %221, %cst_86 [1] : vector<16x32xf32> to vector<16xf32>
    %223 = vector.shape_cast %222 : vector<16xf32> to vector<16x1xf32>
    %cst_87 = arith.constant 3.200000e+01 : f32
    %224 = vector.broadcast %cst_87 : f32 to vector<16x1xf32>
    %225 = arith.divf %223, %224 : vector<16x1xf32>
    %226 = vector.broadcast %225 : vector<16x1xf32> to vector<16x32xf32>
    %227 = arith.subf %221, %226 : vector<16x32xf32>
    %228 = arith.mulf %227, %227 : vector<16x32xf32>
    %cst_88 = arith.constant dense<0.000000e+00> : vector<16xf32>
    %229 = vector.multi_reduction <add>, %228, %cst_88 [1] : vector<16x32xf32> to vector<16xf32>
    %230 = vector.shape_cast %229 : vector<16xf32> to vector<16x1xf32>
    %cst_89 = arith.constant 0.0322580636 : f32
    %231 = vector.broadcast %cst_89 : f32 to vector<16x1xf32>
    %232 = arith.mulf %230, %231 : vector<16x1xf32>
    %233 = math.sqrt %232 : vector<16x1xf32>
    %cst_90 = arith.constant 9.99999997E-7 : f32
    %234 = vector.broadcast %cst_90 : f32 to vector<16x1xf32>
    %235 = arith.addf %233, %234 : vector<16x1xf32>
    %236 = tpu.reciprocal %235 {approx = true} : vector<16x1xf32> -> vector<16x1xf32>
    %c0_91 = arith.constant 0 : index
    %c0_92 = arith.constant 0 : index
    %237 = vector.load %arg12[%c0_91, %c0_92] : memref<1x32xf32, #tpu.memory_space<vmem>>, vector<1x32xf32>
    %238 = vector.broadcast %225 : vector<16x1xf32> to vector<16x32xf32>
    %239 = arith.subf %221, %238 : vector<16x32xf32>
    %240 = vector.broadcast %237 : vector<1x32xf32> to vector<16x32xf32>
    %241 = arith.mulf %240, %239 : vector<16x32xf32>
    %242 = vector.broadcast %236 : vector<16x1xf32> to vector<16x32xf32>
    %243 = arith.mulf %241, %242 : vector<16x32xf32>
    %c0_93 = arith.constant 0 : index
    %c0_94 = arith.constant 0 : index
    %244 = vector.load %arg13[%c0_93, %c0_94] : memref<1x32xf32, #tpu.memory_space<vmem>>, vector<1x32xf32>
    %245 = vector.broadcast %244 : vector<1x32xf32> to vector<16x32xf32>
    %246 = arith.addf %243, %245 : vector<16x32xf32>
    %247 = vector.shape_cast %246 : vector<16x32xf32> to vector<2x8x32xf32>
    %c0_95 = arith.constant 0 : index
    %c0_96 = arith.constant 0 : index
    %c0_97 = arith.constant 0 : index
    %248 = vector.load %arg14[%c0_95, %c0_96, %c0_97] : memref<2x8x32xf32, #tpu.memory_space<vmem>>, vector<2x8x32xf32>
    tpu.vector_store %arg14[%c0_95, %c0_96, %c0_97], %247 {strides = array<i32>} : memref<2x8x32xf32, #tpu.memory_space<vmem>>, vector<2x8x32xf32>,
    return
  }
  func.func @transform_0(%arg0: i32) -> (i32, i32, i32) {
    %c0_i32 = arith.constant 0 : i32
    %c0_i32_0 = arith.constant 0 : i32
    %c0_i32_1 = arith.constant 0 : i32
    return %arg0, %c0_i32, %c0_i32_0 : i32, i32, i32
  }
  func.func @transform_1(%arg0: i32) -> (i32, i32) {
    %c0_i32 = arith.constant 0 : i32
    %c0_i32_0 = arith.constant 0 : i32
    %c0_i32_1 = arith.constant 0 : i32
    return %c0_i32, %c0_i32_0 : i32, i32
  }
  func.func @transform_2(%arg0: i32) -> (i32, i32) {
    %c0_i32 = arith.constant 0 : i32
    %c0_i32_0 = arith.constant 0 : i32
    %c0_i32_1 = arith.constant 0 : i32
    return %c0_i32, %c0_i32_0 : i32, i32
  }
  func.func @transform_3(%arg0: i32) -> (i32, i32) {
    %c0_i32 = arith.constant 0 : i32
    %c0_i32_0 = arith.constant 0 : i32
    %c0_i32_1 = arith.constant 0 : i32
    return %c0_i32, %c0_i32_0 : i32, i32
  }
  func.func @transform_4(%arg0: i32) -> (i32, i32) {
    %c0_i32 = arith.constant 0 : i32
    %c0_i32_0 = arith.constant 0 : i32
    %c0_i32_1 = arith.constant 0 : i32
    return %c0_i32, %c0_i32_0 : i32, i32
  }
  func.func @transform_5(%arg0: i32) -> (i32, i32) {
    %c0_i32 = arith.constant 0 : i32
    %c0_i32_0 = arith.constant 0 : i32
    %c0_i32_1 = arith.constant 0 : i32
    return %c0_i32, %c0_i32_0 : i32, i32
  }
  func.func @transform_6(%arg0: i32) -> (i32, i32) {
    %c0_i32 = arith.constant 0 : i32
    %c0_i32_0 = arith.constant 0 : i32
    %c0_i32_1 = arith.constant 0 : i32
    return %c0_i32, %c0_i32_0 : i32, i32
  }
  func.func @transform_7(%arg0: i32) -> (i32, i32) {
    %c0_i32 = arith.constant 0 : i32
    %c0_i32_0 = arith.constant 0 : i32
    %c0_i32_1 = arith.constant 0 : i32
    return %c0_i32, %c0_i32_0 : i32, i32
  }
  func.func @transform_8(%arg0: i32) -> (i32, i32) {
    %c0_i32 = arith.constant 0 : i32
    %c0_i32_0 = arith.constant 0 : i32
    %c0_i32_1 = arith.constant 0 : i32
    return %c0_i32, %c0_i32_0 : i32, i32
  }
  func.func @transform_9(%arg0: i32) -> (i32, i32) {
    %c0_i32 = arith.constant 0 : i32
    %c0_i32_0 = arith.constant 0 : i32
    %c0_i32_1 = arith.constant 0 : i32
    return %c0_i32, %c0_i32_0 : i32, i32
  }
  func.func @transform_10(%arg0: i32) -> (i32, i32) {
    %c0_i32 = arith.constant 0 : i32
    %c0_i32_0 = arith.constant 0 : i32
    %c0_i32_1 = arith.constant 0 : i32
    return %c0_i32, %c0_i32_0 : i32, i32
  }
  func.func @transform_11(%arg0: i32) -> (i32, i32) {
    %c0_i32 = arith.constant 0 : i32
    %c0_i32_0 = arith.constant 0 : i32
    %c0_i32_1 = arith.constant 0 : i32
    return %c0_i32, %c0_i32_0 : i32, i32
  }
  func.func @transform_12(%arg0: i32) -> (i32, i32) {
    %c0_i32 = arith.constant 0 : i32
    %c0_i32_0 = arith.constant 0 : i32
    %c0_i32_1 = arith.constant 0 : i32
    return %c0_i32, %c0_i32_0 : i32, i32
  }
  func.func @transform_13(%arg0: i32) -> (i32, i32, i32) {
    %c0_i32 = arith.constant 0 : i32
    %c0_i32_0 = arith.constant 0 : i32
    %c0_i32_1 = arith.constant 0 : i32
    return %arg0, %c0_i32, %c0_i32_0 : i32, i32, i32
  }
}

</mosaic_0001>

<bundles_post_ra>
// kernel: tpu_custom_call.1
= control target key start
LH: loop header
LB: loop body
LE: loop exit
PB: predicated region body
PF: predicated region fallthrough
CT: control target
= control target key end

     0   :  { %vm59_vm0 = vcmask 261120   ;;  %s7732_s0 = inlined_call_operand.vmem [shape: f32[2,8,32], index: 0, kind: input, shape index: {}]   ;;  %s7733_s1 = inlined_call_operand.vmem [shape: f32[32,96], index: 1, kind: input, shape index: {}]   ;;  %s7734_s2 = inlined_call_operand.vmem [shape: f32[1,96], index: 2, kind: input, shape index: {}]   ;;  %s7735_s3 = inlined_call_operand.vmem [shape: f32[32,32], index: 3, kind: input, shape index: {}]   ;;  %s7736_s4 = inlined_call_operand.vmem [shape: f32[1,32], index: 4, kind: input, shape index: {}]   ;;  %s7737_s5 = inlined_call_operand.vmem [shape: f32[1,32], index: 5, kind: input, shape index: {}]   ;;  %s7738_s6 = inlined_call_operand.vmem [shape: f32[1,32], index: 6, kind: input, shape index: {}]   ;;  %s7739_s7 = inlined_call_operand.vmem [shape: bf16[32,2048], index: 7, kind: input, shape index: {}]   ;;  %s7740_s8 = inlined_call_operand.vmem [shape: f32[1,2048], index: 8, kind: input, shape index: {}]   ;;  %s7741_s9 = inlined_call_operand.vmem [shape: bf16[2048,32], index: 9, kind: input, shape index: {}]   ;;  %s7742_s10 = inlined_call_operand.vmem [shape: f32[1,32], index: 10, kind: input, shape index: {}]   ;;  %s7743_s11 = inlined_call_operand.vmem [shape: f32[1,32], index: 11, kind: input, shape index: {}]   ;;  %s7744_s12 = inlined_call_operand.vmem [shape: f32[1,32], index: 12, kind: input, shape index: {}]   ;;  %s7745_s13 = inlined_call_operand.hbm [shape: f32[2,8,32], index: 13, kind: output, shape index: {}]  }
   0x1   :  { %v48_v0 = vld [vmem:[%s7733_s1] sm:$0xff]  ;;  %v49_v1 = vld [vmem:[%s7733_s1 + $0x8] sm:$0xff]  ;;  %v50_v2 = vld [vmem:[%s7733_s1 + $0x10] sm:$0xff] }
   0x2   :  { %v6367_v3 = vpack.c.bf16 %v49_v1, %v48_v0  ;;  %v51_v4 = vld [vmem:[%s7733_s1 + $0x18] sm:$0xff]  ;;  %v46_v5 = vld [vmem:[%s7732_s0] sm:$0xff]  ;;  %v47_v7 = vld [vmem:[%s7732_s0 + $0x8] sm:$0xff] }
   0x3   :  { %v6371_v6 = vpack.c.bf16 %v51_v4, %v50_v2  ;;  %6164 = vmatprep.mubr.msk.f32.mxu0 %vm59_vm0, %v46_v5 }
   0x4   :  { %6368 = vmatprep.subr.bf16.mxu0 %v6367_v3 }
   0x5   :  { %6370 = vmatpush3.bf16.msra.mxu0 %v6367_v3 }
   0x6   :  { %6372 = vmatprep.subr.bf16.mxu0 %v6371_v6 }
   0x9   :  { %6374 = vmatpush3.bf16.msra.mxu0 %v6371_v6 }
   0xc   :  { %6165 = vmatmul.mubr.msk.f32.vlgmr.msra.gmra.mrb[0].mxu0 %vm59_vm0, %v47_v7 }
   0xd   :  { %18 = vsyncpa [#allocation3], 0  ;;  %v321_v8 = vld [vmem:[%s7735_s3] sm:$0xf]  ;;  %vm330_vm1 = vcmask 1043456   ;;  %v6638_v9 = vmov 0.0  }
   0xe   :  { %6167 = vmatprep.subr.mxu1 %v6638_v9  ;;  %6177 = vmatprep.subr.msk.mxu0 %vm330_vm1, %v321_v8  ;;  %vm6639_vm2 = vmmov 0   ;;  %v5637_v10 = vld [vmem:[%s7734_s2] ss:$0 sm:$0xff]  ;;  %s6640_s23 = smov 64   ;;  %s6641_s24 = smov 96   ;;  %vm144_vm3 = vcmask 31744  }
   0xf   :  { %6178 = vmatpush3.msk.msra.mxu0 %vm330_vm1, %v321_v8  ;;  %6169 = vmatprep.mubr.msk.f32.mxu1 %vm6639_vm2, %v6638_v9  ;;  %s6642_s25 = smov 92   ;;  %s6643_s2 = smov 124   ;;  %v589_v20 = vld [vmem:[%s7735_s3 + $0x4] sm:$0xf]  ;;  %vm298_vm4 = vcmask 64512  }
  0x10   :  { %6187 = vmatprep.subr.mxu0 %v6638_v9  ;;  %s6644_s26 = smov 60   ;;  %s6645_s29 = smov 88  }
  0x11   :  { %s6646_s30 = smov 120   ;;  %s6647_s14 = smov 56  }
  0x12   :  { %s6648_s17 = smov 84   ;;  %s6649_s18 = smov 116  }
  0x13   :  { %s6650_s19 = smov 52   ;;  %s6651_s21 = smov 80  }
  0x14   :  { %s6652_s22 = smov 112   ;;  %s6656_s27 = smov 44  }
  0x15   :  { %s6659_s15 = smov 40   ;;  %s6662_s20 = smov 36  }
  0xdf   :  { %v6166_v11 = vpop.f32.mrb[0].mxu0 }
  0xe0   :  { %v6769_v12 = vadd.f32 %v6166_v11, %v5637_v10  ;;  %v132_v13 = vpop.f32.mrb[1].mxu0 }
  0xe1   :  { %v6771_v14 = vadd.f32 %v5637_v10, %v132_v13 }
  0xe2   :  { %324 = vrot.lane.b32.xlu1 %v6769_v12, %s6640_s23 }
  0xe3   :  { %142 = vrot.lane.b32.xlu0 %v6771_v14, %s6641_s24 }
  0xe6   :  { %322 = vrot.lane.b32.xlu1 %v6771_v14, %s6640_s23  ;;  %s6653_s23 = smov 48  }
  0xe7   :  { %220 = vrot.lane.b32.xlu0 %v6769_v12, %s6641_s24 }
  0xea   :  { %489 = vrot.lane.b32.xlu1 %v6769_v12, %s6642_s25 }
  0xeb   :  { %411 = vrot.lane.b32.xlu0 %v6771_v14, %s6642_s25 }
  0xee   :  { %487 = vrot.lane.b32.xlu1 %v6769_v12, %s6643_s2 }
  0xef   :  { %409 = vrot.lane.b32.xlu0 %v6771_v14, %s6643_s2  ;;  %s6654_s2 = smov 76  }
  0xf2   :  { %592 = vrot.lane.b32.xlu1 %v6769_v12, %s6644_s26 }
  0xf3   :  { %590 = vrot.lane.b32.xlu0 %v6771_v14, %s6644_s26  ;;  %s6655_s26 = smov 108  }
 0x154   :  { %v325_v15 = vpop.permute.xlu1 %324 }
 0x155   :  { %v143_v16 = vpop.permute.xlu0 %142 }
 0x156   :  { %6168 = vmatpush3.xpose.msk.msra.mxu1 %vm144_vm3, %v143_v16 }
 0x157   :  { %6172 = vmatprep.subr.mxu1 %v6638_v9 }
 0x158   :  { %v323_v17 = vpop.permute.xlu1 %322 }
 0x159   :  { %6170 = vmatmul.mubr.msk.f32.vlgmr.msra.gmra.mrb[0].mxu1 %vm144_vm3, %v6771_v14  ;;  %6179 = vmatprep.mubr.msk.f32.mxu0 %vm144_vm3, %v323_v17  ;;  %v221_v18 = vpop.permute.xlu0 %220 }
 0x15a   :  { %6173 = vmatpush3.xpose.msk.msra.mxu1 %vm144_vm3, %v221_v18  ;;  %6180 = vmatmul.mubr.msk.f32.vlgmr.msra.gmra.mrb[2].mxu0 %vm144_vm3, %v325_v15 }
 0x15b   :  { %6174 = vmatprep.mubr.msk.f32.mxu1 %vm6639_vm2, %v6638_v9  ;;  %6182 = vmatprep.subr.mxu1 %v6638_v9 }
 0x15c   :  { %v490_v19 = vpop.permute.xlu1 %489  ;;  %6189 = vmatprep.mubr.msk.f32.mxu0 %vm6639_vm2, %v6638_v9 }
 0x15d   :  { %6175 = vmatmul.mubr.msk.f32.vlgmr.msra.gmra.mrb[2].mxu1 %vm144_vm3, %v6769_v12  ;;  %6188 = vmatpush3.xpose.msk.msra.mxu0 %vm144_vm3, %v490_v19  ;;  %v412_v21 = vpop.permute.xlu0 %411 }
 0x15e   :  { %6183 = vmatpush3.xpose.msk.msra.mxu1 %vm144_vm3, %v412_v21  ;;  %6184 = vmatprep.mubr.msk.f32.mxu1 %vm6639_vm2, %v6638_v9  ;;  %v1148_v21 = vld [vmem:[%s7735_s3 + $0x8] sm:$0xf] }
 0x15f   :  { %6192 = vmatprep.subr.msk.mxu1 %vm330_vm1, %v589_v20  ;;  %6197 = vmatprep.subr.mxu0 %v6638_v9 }
 0x160   :  { %v488_v22 = vpop.permute.xlu1 %487 }
 0x161   :  { %6190 = vmatmul.mubr.msk.f32.vlgmr.msra.gmra.mrb[4].mxu0 %vm144_vm3, %v488_v22  ;;  %v410_v23 = vpop.permute.xlu0 %409 }
 0x162   :  { %6185 = vmatmul.mubr.msk.f32.vlgmr.msra.gmra.mrb[4].mxu1 %vm144_vm3, %v410_v23  ;;  %6199 = vmatprep.mubr.msk.f32.mxu0 %vm6639_vm2, %v6638_v9 }
 0x163   :  { %6193 = vmatpush3.msk.msra.mxu1 %vm330_vm1, %v589_v20 }
 0x164   :  { %6202 = vmatprep.subr.mxu1 %v6638_v9  ;;  %v593_v25 = vpop.permute.xlu1 %592 }
 0x165   :  { %v591_v24 = vpop.permute.xlu0 %590 }
 0x166   :  { %6194 = vmatprep.mubr.msk.f32.mxu1 %vm144_vm3, %v591_v24 }
 0x167   :  { %6195 = vmatmul.mubr.msk.f32.vlgmr.msra.gmra.mrb[6].mxu1 %vm144_vm3, %v593_v25 }
 0x168   :  { %6204 = vmatprep.mubr.msk.f32.mxu1 %vm6639_vm2, %v6638_v9 }
 0x22c   :  { %v215_v26 = vpop.f32.mrb[0].mxu1 }
 0x22d   :  { %v6171_v27 = vpop.f32.mrb[1].mxu1  ;;  %v6816_v28 = vpop.f32.mrb[2].mxu0  ;;  %v296_v39 = vmul.f32 0.5, %v215_v26 }
 0x22e   :  { %v6818_v29 = vpop.f32.mrb[3].mxu0 }
 0x22f   :  { %v299_v44 = vsel %vm298_vm4, %v296_v39, -inf }
 0x230   :  { %v292_v30 = vpop.f32.mrb[2].mxu1 }
 0x231   :  { %v6176_v31 = vpop.f32.mrb[3].mxu1  ;;  %v297_v43 = vmul.f32 0.5, %v292_v30 }
 0x233   :  { %v302_v45 = vsel %vm298_vm4, %v297_v43, -inf }
 0x234   :  { %v561_v32 = vpop.f32.mrb[4].mxu0 }
 0x235   :  { %v566_v33 = vmul.f32 0.5, %v561_v32  ;;  %v483_v34 = vpop.f32.mrb[4].mxu1  ;;  %v6191_v35 = vpop.f32.mrb[5].mxu0 }
 0x236   :  { %v565_v36 = vmul.f32 0.5, %v483_v34  ;;  %v6186_v37 = vpop.f32.mrb[5].mxu1 }
 0x237   :  { %v570_v38 = vsel %vm298_vm4, %v566_v33, -inf }
 0x238   :  { %571 = vmax.xlane.f32.xlu1 %v570_v38  ;;  %v567_v40 = vsel %vm298_vm4, %v565_v36, -inf }
 0x239   :  { %568 = vmax.xlane.f32.xlu0 %v567_v40 }
 0x23a   :  { %v6196_v41 = vpop.f32.mrb[6].mxu1 }
 0x23b   :  { %v667_v42 = vpop.f32.mrb[7].mxu1  ;;  %6203 = vmatpush3.msra.mxu1 %v6196_v41 }
 0x23c   :  { %6198 = vmatpush3.msra.mxu0 %v667_v42  ;;  %6212 = vmatprep.subr.mxu1 %v6638_v9 }
 0x23d   :  { %300 = vmax.xlane.f32.xlu0 %v299_v44  ;;  %6207 = vmatprep.subr.mxu0 %v6638_v9 }
 0x241   :  { %303 = vmax.xlane.f32.xlu0 %v302_v45 }
 0x249   :  { %970 = vrot.lane.b32.xlu1 %v6771_v14, %s6645_s29 }
 0x2c5   :  { %v572_v46 = vpop.xlane.xlu1 %571 }
 0x2c6   :  { %v574_v47 = vsub.f32 %v566_v33, %v572_v46  ;;  %v569_v48 = vpop.xlane.xlu0 %568 }
 0x2c7   :  { %v573_v50 = vsub.f32 %v565_v36, %v569_v48 }
 0x2c8   :  { %v577_v49 = vmul.f32 1.442695, %v574_v47 }
 0x2c9   :  { %v575_v53 = vmul.f32 1.442695, %v573_v50  ;;  %v971_v3 = vpop.permute.xlu1 %970 }
 0x2ca   :  { %6532 = vpow2.f32 %v577_v49  ;;  %v301_v51 = vpop.xlane.xlu0 %300 }
 0x2cb   :  { %v305_v52 = vsub.f32 %v296_v39, %v301_v51 }
 0x2cd   :  { %v307_v54 = vmul.f32 1.442695, %v305_v52 }
 0x2ce   :  { %v304_v55 = vpop.xlane.xlu0 %303 }
 0x2cf   :  { %6534 = vpow2.f32 %v307_v54  ;;  %v306_v56 = vsub.f32 %v297_v43, %v304_v55 }
 0x2d0   :  { %6536 = vpow2.f32 %v575_v53 }
 0x2d1   :  { %v309_v57 = vmul.f32 1.442695, %v306_v56 }
 0x2d3   :  { %6538 = vpow2.f32 %v309_v57 }
 0x2d4   :  { %v6533_v58 = vpop.eup %6532 }
 0x2d5   :  { %v582_v59 = vsel %vm298_vm4, %v6533_v58, 0.0 }
 0x2d6   :  { %583 = vadd.xlane.f32.xlu0 %v582_v59 }
 0x2d9   :  { %v6535_v60 = vpop.eup %6534 }
 0x2da   :  { %v311_v61 = vsel %vm298_vm4, %v6535_v60, 0.0  ;;  %v6537_v62 = vpop.eup %6536 }
 0x2db   :  { %312 = vadd.xlane.f32.xlu1 %v311_v61  ;;  %v579_v0 = vsel %vm298_vm4, %v6537_v62, 0.0 }
 0x2dd   :  { %v6539_v63 = vpop.eup %6538 }
 0x2de   :  { %v314_v1 = vsel %vm298_vm4, %v6539_v63, 0.0 }
 0x2df   :  { %580 = vadd.xlane.f32.xlu1 %v579_v0  ;;  %315 = vadd.xlane.f32.xlu0 %v314_v1  ;;  %v1563_v0 = vld [vmem:[%s7735_s3 + $0xc] sm:$0xf] }
 0x2f0   :  { %968 = vrot.lane.b32.xlu1 %v6771_v14, %s6646_s30 }
 0x2f4   :  { %1046 = vrot.lane.b32.xlu1 %v6769_v12, %s6646_s30  ;;  %s6657_s30 = smov 72  }
 0x2f5   :  { %1048 = vrot.lane.b32.xlu0 %v6769_v12, %s6645_s29 }
 0x2f8   :  { %1151 = vrot.lane.b32.xlu1 %v6769_v12, %s6647_s14 }
 0x2f9   :  { %1149 = vrot.lane.b32.xlu0 %v6771_v14, %s6647_s14  ;;  %s6658_s14 = smov 104  }
 0x363   :  { %v584_v2 = vpop.xlane.xlu0 %583 }
 0x364   :  { %6540 = vrcp.f32 %v584_v2 }
 0x368   :  { %v313_v4 = vpop.xlane.xlu1 %312 }
 0x36c   :  { %v581_v5 = vpop.xlane.xlu1 %580  ;;  %v316_v6 = vpop.xlane.xlu0 %315 }
 0x36d   :  { %6542 = vrcp.f32 %v581_v5 }
 0x36e   :  { %v6541_v7 = vpop.eup %6540  ;;  %6544 = vrcp.f32 %v316_v6 }
 0x36f   :  { %v588_v8 = vmul.f32 %v6541_v7, %v6533_v58  ;;  %6546 = vrcp.f32 %v313_v4 }
 0x370   :  { %v969_v15 = vpop.permute.xlu1 %968  ;;  %v1049_v18 = vpop.permute.xlu0 %1048 }
 0x371   :  { %6205 = vmatmul.mubr.msk.f32.vlgmr.msra.gmra.mrb[8].mxu1 %vm298_vm4, %v588_v8 }
 0x372   :  { %6213 = vmatpush3.msra.mxu1 %v6816_v28  ;;  %6214 = vmatprep.mubr.msk.f32.mxu1 %vm6639_vm2, %v6638_v9 }
 0x373   :  { %6222 = vmatprep.subr.mxu1 %v6638_v9 }
 0x374   :  { %v1047_v20 = vpop.permute.xlu1 %1046  ;;  %v1150_v22 = vpop.permute.xlu0 %1149 }
 0x377   :  { %v6543_v10 = vpop.eup %6542 }
 0x378   :  { %v6545_v11 = vpop.eup %6544  ;;  %v587_v13 = vmul.f32 %v6543_v10, %v6537_v62  ;;  %v1152_v23 = vpop.permute.xlu1 %1151 }
 0x379   :  { %v6547_v16 = vpop.eup %6546  ;;  %v320_v17 = vmul.f32 %v6545_v11, %v6539_v63 }
 0x37a   :  { %6200 = vmatmul.mubr.msk.f32.vlgmr.msra.gmra.mrb[6].mxu0 %vm298_vm4, %v587_v13  ;;  %v319_v19 = vmul.f32 %v6547_v16, %v6535_v60 }
 0x37b   :  { %6208 = vmatpush3.msra.mxu0 %v6818_v29  ;;  %6215 = vmatmul.mubr.msk.f32.vlgmr.msra.gmra.mrb[10].mxu1 %vm298_vm4, %v320_v17 }
 0x37c   :  { %6223 = vmatpush3.xpose.msk.msra.mxu1 %vm144_vm3, %v1049_v18  ;;  %6209 = vmatprep.mubr.msk.f32.mxu0 %vm6639_vm2, %v6638_v9 }
 0x37d   :  { %6224 = vmatprep.mubr.msk.f32.mxu1 %vm6639_vm2, %v6638_v9  ;;  %6217 = vmatprep.subr.mxu0 %v6638_v9 }
 0x37e   :  { %6210 = vmatmul.mubr.msk.f32.vlgmr.msra.gmra.mrb[8].mxu0 %vm298_vm4, %v319_v19  ;;  %6232 = vmatprep.subr.mxu1 %v6638_v9 }
 0x37f   :  { %6225 = vmatmul.mubr.msk.f32.vlgmr.msra.gmra.mrb[12].mxu1 %vm144_vm3, %v1047_v20  ;;  %6219 = vmatprep.mubr.msk.f32.mxu0 %vm6639_vm2, %v6638_v9 }
 0x380   :  { %6234 = vmatprep.mubr.msk.f32.mxu1 %vm6639_vm2, %v6638_v9 }
 0x382   :  { %6218 = vmatpush3.xpose.msk.msra.mxu0 %vm144_vm3, %v971_v3 }
 0x383   :  { %6227 = vmatprep.subr.msk.mxu0 %vm330_vm1, %v1148_v21 }
 0x385   :  { %6220 = vmatmul.mubr.msk.f32.vlgmr.msra.gmra.mrb[10].mxu0 %vm144_vm3, %v969_v15 }
 0x386   :  { %6229 = vmatprep.mubr.msk.f32.mxu0 %vm144_vm3, %v1150_v22  ;;  %6228 = vmatpush3.msk.msra.mxu0 %vm330_vm1, %v1148_v21 }
 0x387   :  { %6237 = vmatprep.subr.mxu0 %v6638_v9 }
 0x389   :  { %6230 = vmatmul.mubr.msk.f32.vlgmr.msra.gmra.mrb[12].mxu0 %vm144_vm3, %v1152_v23 }
 0x38a   :  { %6239 = vmatprep.mubr.msk.f32.mxu0 %vm6639_vm2, %v6638_v9 }
 0x444   :  { %v818_v24 = vpop.f32.mrb[8].mxu1 }
 0x445   :  { %v6206_v25 = vpop.f32.mrb[9].mxu1 }
 0x44d   :  { %v745_v26 = vpop.f32.mrb[6].mxu0 }
 0x44e   :  { %v964_v27 = vpop.f32.mrb[10].mxu1  ;;  %v6201_v28 = vpop.f32.mrb[7].mxu0 }
 0x44f   :  { %v6871_v29 = vadd.f32 %v964_v27, %v818_v24  ;;  %v6216_v30 = vpop.f32.mrb[11].mxu1 }
 0x451   :  { %v891_v31 = vpop.f32.mrb[8].mxu0 }
 0x452   :  { %v6873_v32 = vadd.f32 %v891_v31, %v745_v26  ;;  %v1120_v33 = vpop.f32.mrb[12].mxu1  ;;  %v6211_v34 = vpop.f32.mrb[9].mxu0 }
 0x453   :  { %v1125_v35 = vmul.f32 0.5, %v1120_v33  ;;  %v6226_v36 = vpop.f32.mrb[13].mxu1 }
 0x455   :  { %v1129_v37 = vsel %vm298_vm4, %v1125_v35, -inf }
 0x456   :  { %1130 = vmax.xlane.f32.xlu1 %v1129_v37 }
 0x458   :  { %v1042_v38 = vpop.f32.mrb[10].mxu0 }
 0x459   :  { %v1124_v39 = vmul.f32 0.5, %v1042_v38  ;;  %v6221_v40 = vpop.f32.mrb[11].mxu0 }
 0x45b   :  { %v1126_v41 = vsel %vm298_vm4, %v1124_v39, -inf }
 0x45c   :  { %1127 = vmax.xlane.f32.xlu0 %v1126_v41  ;;  %v6231_v42 = vpop.f32.mrb[12].mxu0 }
 0x45d   :  { %v1226_v43 = vpop.f32.mrb[13].mxu0  ;;  %6238 = vmatpush3.msra.mxu0 %v6231_v42  ;;  %v1978_v42 = vld [vmem:[%s7735_s3 + $0x10] sm:$0xf] }
 0x45e   :  { %6233 = vmatpush3.msra.mxu1 %v1226_v43  ;;  %6247 = vmatprep.subr.mxu0 %v6638_v9 }
 0x45f   :  { %6242 = vmatprep.subr.mxu1 %v6638_v9 }
 0x467   :  { %1385 = vrot.lane.b32.xlu1 %v6771_v14, %s6648_s17 }
 0x46b   :  { %1383 = vrot.lane.b32.xlu1 %v6771_v14, %s6649_s18 }
 0x46f   :  { %1461 = vrot.lane.b32.xlu1 %v6769_v12, %s6649_s18  ;;  %s6660_s18 = smov 68  }
 0x473   :  { %1566 = vrot.lane.b32.xlu1 %v6769_v12, %s6650_s19 }
 0x4e3   :  { %v1131_v44 = vpop.xlane.xlu1 %1130 }
 0x4e4   :  { %v1133_v45 = vsub.f32 %v1125_v35, %v1131_v44 }
 0x4e6   :  { %v1136_v46 = vmul.f32 1.442695, %v1133_v45 }
 0x4e7   :  { %v1386_v55 = vpop.permute.xlu1 %1385 }
 0x4e8   :  { %6548 = vpow2.f32 %v1136_v46 }
 0x4e9   :  { %v1128_v47 = vpop.xlane.xlu0 %1127 }
 0x4ea   :  { %v1132_v48 = vsub.f32 %v1124_v39, %v1128_v47 }
 0x4eb   :  { %v1384_v58 = vpop.permute.xlu1 %1383 }
 0x4ec   :  { %v1134_v49 = vmul.f32 1.442695, %v1132_v48 }
 0x4ee   :  { %6550 = vpow2.f32 %v1134_v49 }
 0x4ef   :  { %v1462_v62 = vpop.permute.xlu1 %1461 }
 0x4f2   :  { %v6549_v50 = vpop.eup %6548 }
 0x4f3   :  { %v1141_v51 = vsel %vm298_vm4, %v6549_v50, 0.0  ;;  %v1567_v2 = vpop.permute.xlu1 %1566 }
 0x4f4   :  { %1142 = vadd.xlane.f32.xlu0 %v1141_v51 }
 0x4f8   :  { %v6551_v52 = vpop.eup %6550 }
 0x4f9   :  { %v1138_v53 = vsel %vm298_vm4, %v6551_v52, 0.0 }
 0x4fa   :  { %1139 = vadd.xlane.f32.xlu0 %v1138_v53 }
 0x510   :  { %1463 = vrot.lane.b32.xlu0 %v6769_v12, %s6648_s17 }
 0x514   :  { %1564 = vrot.lane.b32.xlu0 %v6771_v14, %s6650_s19  ;;  %s6661_s19 = smov 100  }
 0x581   :  { %v1143_v54 = vpop.xlane.xlu0 %1142 }
 0x582   :  { %6552 = vrcp.f32 %v1143_v54 }
 0x587   :  { %v1140_v56 = vpop.xlane.xlu0 %1139 }
 0x588   :  { %6554 = vrcp.f32 %v1140_v56 }
 0x58b   :  { %v1464_v60 = vpop.permute.xlu0 %1463 }
 0x58c   :  { %v6553_v57 = vpop.eup %6552 }
 0x58d   :  { %v1147_v59 = vmul.f32 %v6553_v57, %v6549_v50 }
 0x58f   :  { %6240 = vmatmul.mubr.msk.f32.vlgmr.msra.gmra.mrb[14].mxu0 %vm298_vm4, %v1147_v59  ;;  %v1565_v1 = vpop.permute.xlu0 %1564 }
 0x590   :  { %6248 = vmatpush3.xpose.msk.msra.mxu0 %vm144_vm3, %v1464_v60  ;;  %6249 = vmatprep.mubr.msk.f32.mxu0 %vm6639_vm2, %v6638_v9 }
 0x591   :  { %6257 = vmatprep.subr.mxu0 %v6638_v9 }
 0x592   :  { %v6555_v61 = vpop.eup %6554 }
 0x593   :  { %v1146_v63 = vmul.f32 %v6555_v61, %v6551_v52  ;;  %6250 = vmatmul.mubr.msk.f32.vlgmr.msra.gmra.mrb[16].mxu0 %vm144_vm3, %v1462_v62 }
 0x594   :  { %6259 = vmatprep.mubr.msk.f32.mxu0 %vm6639_vm2, %v6638_v9 }
 0x595   :  { %6235 = vmatmul.mubr.msk.f32.vlgmr.msra.gmra.mrb[14].mxu1 %vm298_vm4, %v1146_v63 }
 0x596   :  { %6243 = vmatpush3.xpose.msk.msra.mxu1 %vm144_vm3, %v1386_v55  ;;  %6244 = vmatprep.mubr.msk.f32.mxu1 %vm6639_vm2, %v6638_v9 }
 0x597   :  { %6252 = vmatprep.subr.msk.mxu1 %vm330_vm1, %v1563_v0 }
 0x599   :  { %6245 = vmatmul.mubr.msk.f32.vlgmr.msra.gmra.mrb[16].mxu1 %vm144_vm3, %v1384_v58 }
 0x59a   :  { %6254 = vmatprep.mubr.msk.f32.mxu1 %vm144_vm3, %v1565_v1  ;;  %6253 = vmatpush3.msk.msra.mxu1 %vm330_vm1, %v1563_v0 }
 0x59b   :  { %6262 = vmatprep.subr.mxu1 %v6638_v9 }
 0x59d   :  { %6255 = vmatmul.mubr.msk.f32.vlgmr.msra.gmra.mrb[18].mxu1 %vm144_vm3, %v1567_v2 }
 0x59e   :  { %6264 = vmatprep.mubr.msk.f32.mxu1 %vm6639_vm2, %v6638_v9 }
 0x662   :  { %v1377_v3 = vpop.f32.mrb[14].mxu0 }
 0x663   :  { %v6911_v4 = vadd.f32 %v1377_v3, %v6871_v29  ;;  %v6241_v5 = vpop.f32.mrb[15].mxu0 }
 0x666   :  { %v1535_v6 = vpop.f32.mrb[16].mxu0 }
 0x667   :  { %v1540_v7 = vmul.f32 0.5, %v1535_v6  ;;  %v6251_v8 = vpop.f32.mrb[17].mxu0 }
 0x668   :  { %v1304_v10 = vpop.f32.mrb[14].mxu1 }
 0x669   :  { %v6914_v11 = vadd.f32 %v1304_v10, %v6873_v32  ;;  %v6236_v13 = vpop.f32.mrb[15].mxu1  ;;  %v1544_v15 = vsel %vm298_vm4, %v1540_v7, -inf }
 0x66a   :  { %1545 = vmax.xlane.f32.xlu1 %v1544_v15 }
 0x66c   :  { %v1457_v16 = vpop.f32.mrb[16].mxu1 }
 0x66d   :  { %v1539_v17 = vmul.f32 0.5, %v1457_v16  ;;  %v6246_v18 = vpop.f32.mrb[17].mxu1 }
 0x66f   :  { %v1541_v19 = vsel %vm298_vm4, %v1539_v17, -inf }
 0x670   :  { %1542 = vmax.xlane.f32.xlu0 %v1541_v19  ;;  %v6256_v20 = vpop.f32.mrb[18].mxu1 }
 0x671   :  { %v1641_v21 = vpop.f32.mrb[19].mxu1  ;;  %6263 = vmatpush3.msra.mxu1 %v6256_v20  ;;  %v2393_v20 = vld [vmem:[%s7735_s3 + $0x14] sm:$0xf] }
 0x672   :  { %6258 = vmatpush3.msra.mxu0 %v1641_v21  ;;  %6272 = vmatprep.subr.mxu1 %v6638_v9 }
 0x673   :  { %6267 = vmatprep.subr.mxu0 %v6638_v9 }
 0x67b   :  { %1800 = vrot.lane.b32.xlu1 %v6771_v14, %s6651_s21 }
 0x67f   :  { %1798 = vrot.lane.b32.xlu1 %v6771_v14, %s6652_s22 }
 0x683   :  { %1876 = vrot.lane.b32.xlu1 %v6769_v12, %s6652_s22 }
 0x687   :  { %1981 = vrot.lane.b32.xlu1 %v6769_v12, %s6653_s23 }
 0x6f7   :  { %v1546_v22 = vpop.xlane.xlu1 %1545 }
 0x6f8   :  { %v1548_v23 = vsub.f32 %v1540_v7, %v1546_v22 }
 0x6fa   :  { %v1551_v24 = vmul.f32 1.442695, %v1548_v23 }
 0x6fb   :  { %v1801_v33 = vpop.permute.xlu1 %1800 }
 0x6fc   :  { %6556 = vpow2.f32 %v1551_v24 }
 0x6fd   :  { %v1543_v25 = vpop.xlane.xlu0 %1542 }
 0x6fe   :  { %v1547_v26 = vsub.f32 %v1539_v17, %v1543_v25 }
 0x6ff   :  { %v1799_v36 = vpop.permute.xlu1 %1798 }
 0x700   :  { %v1549_v27 = vmul.f32 1.442695, %v1547_v26 }
 0x702   :  { %6558 = vpow2.f32 %v1549_v27 }
 0x703   :  { %v1877_v40 = vpop.permute.xlu1 %1876 }
 0x706   :  { %v6557_v28 = vpop.eup %6556 }
 0x707   :  { %v1556_v29 = vsel %vm298_vm4, %v6557_v28, 0.0  ;;  %v1982_v44 = vpop.permute.xlu1 %1981 }
 0x708   :  { %1557 = vadd.xlane.f32.xlu0 %v1556_v29 }
 0x70c   :  { %v6559_v30 = vpop.eup %6558 }
 0x70d   :  { %v1553_v31 = vsel %vm298_vm4, %v6559_v30, 0.0 }
 0x70e   :  { %1554 = vadd.xlane.f32.xlu0 %v1553_v31 }
 0x724   :  { %1878 = vrot.lane.b32.xlu0 %v6769_v12, %s6651_s21 }
 0x728   :  { %1979 = vrot.lane.b32.xlu0 %v6771_v14, %s6653_s23 }
 0x795   :  { %v1558_v32 = vpop.xlane.xlu0 %1557 }
 0x796   :  { %6560 = vrcp.f32 %v1558_v32 }
 0x79b   :  { %v1555_v34 = vpop.xlane.xlu0 %1554 }
 0x79c   :  { %6562 = vrcp.f32 %v1555_v34 }
 0x79f   :  { %v1879_v38 = vpop.permute.xlu0 %1878 }
 0x7a0   :  { %v6561_v35 = vpop.eup %6560 }
 0x7a1   :  { %v1562_v37 = vmul.f32 %v6561_v35, %v6557_v28 }
 0x7a3   :  { %6265 = vmatmul.mubr.msk.f32.vlgmr.msra.gmra.mrb[20].mxu1 %vm298_vm4, %v1562_v37  ;;  %v1980_v43 = vpop.permute.xlu0 %1979 }
 0x7a4   :  { %6273 = vmatpush3.xpose.msk.msra.mxu1 %vm144_vm3, %v1879_v38  ;;  %6274 = vmatprep.mubr.msk.f32.mxu1 %vm6639_vm2, %v6638_v9 }
 0x7a5   :  { %6282 = vmatprep.subr.mxu1 %v6638_v9 }
 0x7a6   :  { %v6563_v39 = vpop.eup %6562 }
 0x7a7   :  { %v1561_v41 = vmul.f32 %v6563_v39, %v6559_v30  ;;  %6275 = vmatmul.mubr.msk.f32.vlgmr.msra.gmra.mrb[22].mxu1 %vm144_vm3, %v1877_v40 }
 0x7a8   :  { %6284 = vmatprep.mubr.msk.f32.mxu1 %vm6639_vm2, %v6638_v9 }
 0x7a9   :  { %6260 = vmatmul.mubr.msk.f32.vlgmr.msra.gmra.mrb[18].mxu0 %vm298_vm4, %v1561_v41 }
 0x7aa   :  { %6268 = vmatpush3.xpose.msk.msra.mxu0 %vm144_vm3, %v1801_v33  ;;  %6269 = vmatprep.mubr.msk.f32.mxu0 %vm6639_vm2, %v6638_v9 }
 0x7ab   :  { %6277 = vmatprep.subr.msk.mxu0 %vm330_vm1, %v1978_v42 }
 0x7ad   :  { %6270 = vmatmul.mubr.msk.f32.vlgmr.msra.gmra.mrb[20].mxu0 %vm144_vm3, %v1799_v36 }
 0x7ae   :  { %6279 = vmatprep.mubr.msk.f32.mxu0 %vm144_vm3, %v1980_v43  ;;  %6278 = vmatpush3.msk.msra.mxu0 %vm330_vm1, %v1978_v42 }
 0x7af   :  { %6287 = vmatprep.subr.mxu0 %v6638_v9 }
 0x7b1   :  { %6280 = vmatmul.mubr.msk.f32.vlgmr.msra.gmra.mrb[22].mxu0 %vm144_vm3, %v1982_v44 }
 0x7b2   :  { %6289 = vmatprep.mubr.msk.f32.mxu0 %vm6639_vm2, %v6638_v9 }
 0x876   :  { %v1792_v45 = vpop.f32.mrb[20].mxu1 }
 0x877   :  { %v6952_v46 = vadd.f32 %v1792_v45, %v6911_v4  ;;  %v6266_v47 = vpop.f32.mrb[21].mxu1 }
 0x87a   :  { %v1950_v48 = vpop.f32.mrb[22].mxu1 }
 0x87b   :  { %v1955_v49 = vmul.f32 0.5, %v1950_v48  ;;  %v6276_v50 = vpop.f32.mrb[23].mxu1 }
 0x87c   :  { %v1719_v51 = vpop.f32.mrb[18].mxu0 }
 0x87d   :  { %v6955_v52 = vadd.f32 %v1719_v51, %v6914_v11  ;;  %v6261_v53 = vpop.f32.mrb[19].mxu0  ;;  %v1959_v54 = vsel %vm298_vm4, %v1955_v49, -inf }
 0x87e   :  { %1960 = vmax.xlane.f32.xlu1 %v1959_v54 }
 0x880   :  { %v1872_v55 = vpop.f32.mrb[20].mxu0 }
 0x881   :  { %v1954_v56 = vmul.f32 0.5, %v1872_v55  ;;  %v6271_v57 = vpop.f32.mrb[21].mxu0 }
 0x883   :  { %v1956_v58 = vsel %vm298_vm4, %v1954_v56, -inf }
 0x884   :  { %1957 = vmax.xlane.f32.xlu0 %v1956_v58  ;;  %v6281_v59 = vpop.f32.mrb[22].mxu0 }
 0x885   :  { %v2056_v60 = vpop.f32.mrb[23].mxu0  ;;  %6288 = vmatpush3.msra.mxu0 %v6281_v59  ;;  %v2808_v59 = vld [vmem:[%s7735_s3 + $0x18] sm:$0xf] }
 0x886   :  { %6283 = vmatpush3.msra.mxu1 %v2056_v60  ;;  %6297 = vmatprep.subr.mxu0 %v6638_v9 }
 0x887   :  { %6292 = vmatprep.subr.mxu1 %v6638_v9 }
 0x88f   :  { %2215 = vrot.lane.b32.xlu1 %v6771_v14, %s6654_s2 }
 0x893   :  { %2213 = vrot.lane.b32.xlu1 %v6771_v14, %s6655_s26 }
 0x897   :  { %2291 = vrot.lane.b32.xlu1 %v6769_v12, %s6655_s26 }
 0x89b   :  { %2396 = vrot.lane.b32.xlu1 %v6769_v12, %s6656_s27 }
 0x90b   :  { %v1961_v61 = vpop.xlane.xlu1 %1960 }
 0x90c   :  { %v1963_v62 = vsub.f32 %v1955_v49, %v1961_v61 }
 0x90e   :  { %v1966_v63 = vmul.f32 1.442695, %v1963_v62 }
 0x90f   :  { %v2216_v8 = vpop.permute.xlu1 %2215 }
 0x910   :  { %6564 = vpow2.f32 %v1966_v63 }
 0x911   :  { %v1958_v0 = vpop.xlane.xlu0 %1957 }
 0x912   :  { %v1962_v1 = vsub.f32 %v1954_v56, %v1958_v0 }
 0x913   :  { %v2214_v13 = vpop.permute.xlu1 %2213 }
 0x914   :  { %v1964_v2 = vmul.f32 1.442695, %v1962_v1 }
 0x916   :  { %6566 = vpow2.f32 %v1964_v2 }
 0x917   :  { %v2292_v18 = vpop.permute.xlu1 %2291 }
 0x91a   :  { %v6565_v3 = vpop.eup %6564 }
 0x91b   :  { %v1971_v4 = vsel %vm298_vm4, %v6565_v3, 0.0  ;;  %v2397_v22 = vpop.permute.xlu1 %2396 }
 0x91c   :  { %1972 = vadd.xlane.f32.xlu0 %v1971_v4 }
 0x920   :  { %v6567_v5 = vpop.eup %6566 }
 0x921   :  { %v1968_v6 = vsel %vm298_vm4, %v6567_v5, 0.0 }
 0x922   :  { %1969 = vadd.xlane.f32.xlu0 %v1968_v6 }
 0x938   :  { %2293 = vrot.lane.b32.xlu0 %v6769_v12, %s6654_s2 }
 0x93c   :  { %2394 = vrot.lane.b32.xlu0 %v6771_v14, %s6656_s27  ;;  %s6664_s27 = smov [#allocation2]  }
 0x93d   :  { %s5626_s28 = sshll.u32 %s6664_s27, 4  ;;  %s5627_s28 = int_to_ptr.vmem [resolvable:$true] %s5626_s28 }
 0x93e   :  { %p6619_p1 = scmp.lt.s32.totalorder %s5627_s28, %s5627_s28 }
 0x9a9   :  { %v1973_v7 = vpop.xlane.xlu0 %1972 }
 0x9aa   :  { %6568 = vrcp.f32 %v1973_v7 }
 0x9af   :  { %v1970_v10 = vpop.xlane.xlu0 %1969 }
 0x9b0   :  { %6570 = vrcp.f32 %v1970_v10 }
 0x9b3   :  { %v2294_v16 = vpop.permute.xlu0 %2293 }
 0x9b4   :  { %v6569_v11 = vpop.eup %6568 }
 0x9b5   :  { %v1977_v15 = vmul.f32 %v6569_v11, %v6565_v3 }
 0x9b7   :  { %6290 = vmatmul.mubr.msk.f32.vlgmr.msra.gmra.mrb[24].mxu0 %vm298_vm4, %v1977_v15  ;;  %v2395_v21 = vpop.permute.xlu0 %2394 }
 0x9b8   :  { %6298 = vmatpush3.xpose.msk.msra.mxu0 %vm144_vm3, %v2294_v16  ;;  %6299 = vmatprep.mubr.msk.f32.mxu0 %vm6639_vm2, %v6638_v9 }
 0x9b9   :  { %6307 = vmatprep.subr.mxu0 %v6638_v9 }
 0x9ba   :  { %v6571_v17 = vpop.eup %6570 }
 0x9bb   :  { %v1976_v19 = vmul.f32 %v6571_v17, %v6567_v5  ;;  %6300 = vmatmul.mubr.msk.f32.vlgmr.msra.gmra.mrb[26].mxu0 %vm144_vm3, %v2292_v18 }
 0x9bc   :  { %6309 = vmatprep.mubr.msk.f32.mxu0 %vm6639_vm2, %v6638_v9 }
 0x9bd   :  { %6285 = vmatmul.mubr.msk.f32.vlgmr.msra.gmra.mrb[24].mxu1 %vm298_vm4, %v1976_v19 }
 0x9be   :  { %6293 = vmatpush3.xpose.msk.msra.mxu1 %vm144_vm3, %v2216_v8  ;;  %6294 = vmatprep.mubr.msk.f32.mxu1 %vm6639_vm2, %v6638_v9 }
 0x9bf   :  { %6302 = vmatprep.subr.msk.mxu1 %vm330_vm1, %v2393_v20 }
 0x9c1   :  { %6295 = vmatmul.mubr.msk.f32.vlgmr.msra.gmra.mrb[26].mxu1 %vm144_vm3, %v2214_v13 }
 0x9c2   :  { %6304 = vmatprep.mubr.msk.f32.mxu1 %vm144_vm3, %v2395_v21  ;;  %6303 = vmatpush3.msk.msra.mxu1 %vm330_vm1, %v2393_v20 }
 0x9c3   :  { %6312 = vmatprep.subr.mxu1 %v6638_v9 }
 0x9c5   :  { %6305 = vmatmul.mubr.msk.f32.vlgmr.msra.gmra.mrb[28].mxu1 %vm144_vm3, %v2397_v22 }
 0x9c6   :  { %6314 = vmatprep.mubr.msk.f32.mxu1 %vm6639_vm2, %v6638_v9 }
 0xa8a   :  { %v2207_v23 = vpop.f32.mrb[24].mxu0 }
 0xa8b   :  { %v6993_v24 = vadd.f32 %v2207_v23, %v6952_v46  ;;  %v6291_v25 = vpop.f32.mrb[25].mxu0 }
 0xa8e   :  { %v2365_v26 = vpop.f32.mrb[26].mxu0 }
 0xa8f   :  { %v2370_v27 = vmul.f32 0.5, %v2365_v26  ;;  %v6301_v28 = vpop.f32.mrb[27].mxu0 }
 0xa90   :  { %v2134_v29 = vpop.f32.mrb[24].mxu1 }
 0xa91   :  { %v6996_v30 = vadd.f32 %v2134_v29, %v6955_v52  ;;  %v6286_v31 = vpop.f32.mrb[25].mxu1  ;;  %v2374_v32 = vsel %vm298_vm4, %v2370_v27, -inf }
 0xa92   :  { %2375 = vmax.xlane.f32.xlu1 %v2374_v32 }
 0xa94   :  { %v2287_v33 = vpop.f32.mrb[26].mxu1 }
 0xa95   :  { %v2369_v34 = vmul.f32 0.5, %v2287_v33  ;;  %v6296_v35 = vpop.f32.mrb[27].mxu1 }
 0xa96   :  { %v3223_v35 = vld [vmem:[%s7735_s3 + $0x1c] sm:$0xf] }
 0xa97   :  { %v2371_v36 = vsel %vm298_vm4, %v2369_v34, -inf }
 0xa98   :  { %2372 = vmax.xlane.f32.xlu0 %v2371_v36  ;;  %v6306_v37 = vpop.f32.mrb[28].mxu1 }
 0xa99   :  { %v2471_v38 = vpop.f32.mrb[29].mxu1  ;;  %6313 = vmatpush3.msra.mxu1 %v6306_v37 }
 0xa9a   :  { %6308 = vmatpush3.msra.mxu0 %v2471_v38  ;;  %6322 = vmatprep.subr.mxu1 %v6638_v9 }
 0xa9b   :  { %6317 = vmatprep.subr.mxu0 %v6638_v9 }
 0xaa3   :  { %2630 = vrot.lane.b32.xlu1 %v6771_v14, %s6657_s30 }
 0xaa7   :  { %2628 = vrot.lane.b32.xlu1 %v6771_v14, %s6658_s14 }
 0xaab   :  { %2706 = vrot.lane.b32.xlu1 %v6769_v12, %s6658_s14 }
 0xaaf   :  { %2811 = vrot.lane.b32.xlu1 %v6769_v12, %s6659_s15 }
 0xb1f   :  { %v2376_v39 = vpop.xlane.xlu1 %2375 }
 0xb20   :  { %v2378_v40 = vsub.f32 %v2370_v27, %v2376_v39 }
 0xb22   :  { %v2381_v41 = vmul.f32 1.442695, %v2378_v40 }
 0xb23   :  { %v2631_v50 = vpop.permute.xlu1 %2630 }
 0xb24   :  { %6572 = vpow2.f32 %v2381_v41 }
 0xb25   :  { %v2373_v42 = vpop.xlane.xlu0 %2372 }
 0xb26   :  { %v2377_v43 = vsub.f32 %v2369_v34, %v2373_v42 }
 0xb27   :  { %v2629_v53 = vpop.permute.xlu1 %2628 }
 0xb28   :  { %v2379_v44 = vmul.f32 1.442695, %v2377_v43 }
 0xb2a   :  { %6574 = vpow2.f32 %v2379_v44 }
 0xb2b   :  { %v2707_v57 = vpop.permute.xlu1 %2706 }
 0xb2e   :  { %v6573_v45 = vpop.eup %6572 }
 0xb2f   :  { %v2386_v46 = vsel %vm298_vm4, %v6573_v45, 0.0  ;;  %v2812_v61 = vpop.permute.xlu1 %2811 }
 0xb30   :  { %2387 = vadd.xlane.f32.xlu0 %v2386_v46 }
 0xb34   :  { %v6575_v47 = vpop.eup %6574 }
 0xb35   :  { %v2383_v48 = vsel %vm298_vm4, %v6575_v47, 0.0 }
 0xb36   :  { %2384 = vadd.xlane.f32.xlu0 %v2383_v48 }
 0xb4c   :  { %2708 = vrot.lane.b32.xlu0 %v6769_v12, %s6657_s30 }
 0xb50   :  { %2809 = vrot.lane.b32.xlu0 %v6771_v14, %s6659_s15 }
 0xbbd   :  { %v2388_v49 = vpop.xlane.xlu0 %2387 }
 0xbbe   :  { %6576 = vrcp.f32 %v2388_v49 }
 0xbc3   :  { %v2385_v51 = vpop.xlane.xlu0 %2384 }
 0xbc4   :  { %6578 = vrcp.f32 %v2385_v51 }
 0xbc7   :  { %v2709_v55 = vpop.permute.xlu0 %2708 }
 0xbc8   :  { %v6577_v52 = vpop.eup %6576 }
 0xbc9   :  { %v2392_v54 = vmul.f32 %v6577_v52, %v6573_v45 }
 0xbcb   :  { %6315 = vmatmul.mubr.msk.f32.vlgmr.msra.gmra.mrb[30].mxu1 %vm298_vm4, %v2392_v54  ;;  %v2810_v60 = vpop.permute.xlu0 %2809 }
 0xbcc   :  { %6323 = vmatpush3.xpose.msk.msra.mxu1 %vm144_vm3, %v2709_v55  ;;  %6324 = vmatprep.mubr.msk.f32.mxu1 %vm6639_vm2, %v6638_v9 }
 0xbcd   :  { %6332 = vmatprep.subr.mxu1 %v6638_v9 }
 0xbce   :  { %v6579_v56 = vpop.eup %6578 }
 0xbcf   :  { %v2391_v58 = vmul.f32 %v6579_v56, %v6575_v47  ;;  %6325 = vmatmul.mubr.msk.f32.vlgmr.msra.gmra.mrb[32].mxu1 %vm144_vm3, %v2707_v57 }
 0xbd0   :  { %6334 = vmatprep.mubr.msk.f32.mxu1 %vm6639_vm2, %v6638_v9 }
 0xbd1   :  { %6310 = vmatmul.mubr.msk.f32.vlgmr.msra.gmra.mrb[28].mxu0 %vm298_vm4, %v2391_v58 }
 0xbd2   :  { %6318 = vmatpush3.xpose.msk.msra.mxu0 %vm144_vm3, %v2631_v50  ;;  %6319 = vmatprep.mubr.msk.f32.mxu0 %vm6639_vm2, %v6638_v9 }
 0xbd3   :  { %6327 = vmatprep.subr.msk.mxu0 %vm330_vm1, %v2808_v59 }
 0xbd5   :  { %6320 = vmatmul.mubr.msk.f32.vlgmr.msra.gmra.mrb[30].mxu0 %vm144_vm3, %v2629_v53 }
 0xbd6   :  { %6329 = vmatprep.mubr.msk.f32.mxu0 %vm144_vm3, %v2810_v60  ;;  %6328 = vmatpush3.msk.msra.mxu0 %vm330_vm1, %v2808_v59 }
 0xbd7   :  { %6337 = vmatprep.subr.mxu0 %v6638_v9 }
 0xbd9   :  { %6330 = vmatmul.mubr.msk.f32.vlgmr.msra.gmra.mrb[32].mxu0 %vm144_vm3, %v2812_v61 }
 0xbda   :  { %6339 = vmatprep.mubr.msk.f32.mxu0 %vm6639_vm2, %v6638_v9 }
 0xc9e   :  { %v2622_v62 = vpop.f32.mrb[30].mxu1 }
 0xc9f   :  { %v7034_v63 = vadd.f32 %v2622_v62, %v6993_v24  ;;  %v6316_v0 = vpop.f32.mrb[31].mxu1 }
 0xca2   :  { %v2780_v1 = vpop.f32.mrb[32].mxu1 }
 0xca3   :  { %v2785_v2 = vmul.f32 0.5, %v2780_v1  ;;  %v6326_v3 = vpop.f32.mrb[33].mxu1 }
 0xca4   :  { %v2549_v4 = vpop.f32.mrb[28].mxu0 }
 0xca5   :  { %v7037_v5 = vadd.f32 %v2549_v4, %v6996_v30  ;;  %v6311_v6 = vpop.f32.mrb[29].mxu0  ;;  %v2789_v7 = vsel %vm298_vm4, %v2785_v2, -inf }
 0xca6   :  { %2790 = vmax.xlane.f32.xlu1 %v2789_v7  ;;  %v5712_v6 = vld [vmem:[%s7736_s4] ss:$0 sm:$0xff] }
 0xca8   :  { %v2702_v8 = vpop.f32.mrb[30].mxu0 }
 0xca9   :  { %v2784_v10 = vmul.f32 0.5, %v2702_v8  ;;  %v6321_v11 = vpop.f32.mrb[31].mxu0 }
 0xcab   :  { %v2786_v13 = vsel %vm298_vm4, %v2784_v10, -inf }
 0xcac   :  { %2787 = vmax.xlane.f32.xlu0 %v2786_v13  ;;  %v6331_v15 = vpop.f32.mrb[32].mxu0 }
 0xcad   :  { %v2886_v16 = vpop.f32.mrb[33].mxu0  ;;  %6338 = vmatpush3.msra.mxu0 %v6331_v15 }
 0xcae   :  { %6333 = vmatpush3.msra.mxu1 %v2886_v16  ;;  %6347 = vmatprep.subr.mxu0 %v6638_v9  ;;  %v6612_v16 = vld [vmem:[%s7732_s0] sm:$0xff] }
 0xcaf   :  { %6342 = vmatprep.subr.mxu1 %v6638_v9 }
 0xcb7   :  { %3045 = vrot.lane.b32.xlu1 %v6771_v14, %s6660_s18 }
 0xcbb   :  { %3043 = vrot.lane.b32.xlu1 %v6771_v14, %s6661_s19 }
 0xcbf   :  { %3121 = vrot.lane.b32.xlu1 %v6769_v12, %s6661_s19 }
 0xcc3   :  { %3226 = vrot.lane.b32.xlu1 %v6769_v12, %s6662_s20 }
 0xd33   :  { %v2791_v17 = vpop.xlane.xlu1 %2790 }
 0xd34   :  { %v2793_v18 = vsub.f32 %v2785_v2, %v2791_v17 }
 0xd36   :  { %v2796_v19 = vmul.f32 1.442695, %v2793_v18 }
 0xd37   :  { %v3046_v28 = vpop.permute.xlu1 %3045 }
 0xd38   :  { %6580 = vpow2.f32 %v2796_v19 }
 0xd39   :  { %v2788_v20 = vpop.xlane.xlu0 %2787 }
 0xd3a   :  { %v2792_v21 = vsub.f32 %v2784_v10, %v2788_v20  ;;  %v6613_v20 = vld [vmem:[%s7732_s0 + $0x8] sm:$0xff] }
 0xd3b   :  { %v3044_v31 = vpop.permute.xlu1 %3043 }
 0xd3c   :  { %v2794_v22 = vmul.f32 1.442695, %v2792_v21 }
 0xd3e   :  { %6582 = vpow2.f32 %v2794_v22 }
 0xd42   :  { %v6581_v23 = vpop.eup %6580 }
 0xd43   :  { %v2801_v24 = vsel %vm298_vm4, %v6581_v23, 0.0 }
 0xd44   :  { %2802 = vadd.xlane.f32.xlu0 %v2801_v24 }
 0xd48   :  { %v6583_v25 = vpop.eup %6582 }
 0xd49   :  { %v2798_v26 = vsel %vm298_vm4, %v6583_v25, 0.0 }
 0xd4a   :  { %2799 = vadd.xlane.f32.xlu0 %v2798_v26 }
 0xd60   :  { %3123 = vrot.lane.b32.xlu0 %v6769_v12, %s6660_s18 }
 0xd64   :  { %3224 = vrot.lane.b32.xlu0 %v6771_v14, %s6662_s20  ;;  %v3122_v14 = vpop.permute.xlu1 %3121 }
 0xd68   :  { %v3227_v37 = vpop.permute.xlu1 %3226 }
 0xdd1   :  { %v2803_v27 = vpop.xlane.xlu0 %2802 }
 0xdd2   :  { %6584 = vrcp.f32 %v2803_v27 }
 0xdd7   :  { %v2800_v29 = vpop.xlane.xlu0 %2799 }
 0xdd8   :  { %6586 = vrcp.f32 %v2800_v29 }
 0xddb   :  { %v3124_v33 = vpop.permute.xlu0 %3123 }
 0xddc   :  { %v6585_v30 = vpop.eup %6584 }
 0xddd   :  { %v2807_v32 = vmul.f32 %v6585_v30, %v6581_v23 }
 0xddf   :  { %6340 = vmatmul.mubr.msk.f32.vlgmr.msra.gmra.mrb[34].mxu0 %vm298_vm4, %v2807_v32  ;;  %v3225_v36 = vpop.permute.xlu0 %3224 }
 0xde0   :  { %6348 = vmatpush3.xpose.msk.msra.mxu0 %vm144_vm3, %v3124_v33  ;;  %6349 = vmatprep.mubr.msk.f32.mxu0 %vm6639_vm2, %v6638_v9  ;;  %v3529_v33 = vld [vmem:[%s7739_s7] sm:$0xff] }
 0xde1   :  { %6357 = vmatprep.subr.mxu0 %v6638_v9 }
 0xde2   :  { %v6587_v12 = vpop.eup %6586 }
 0xde3   :  { %v2806_v34 = vmul.f32 %v6587_v12, %v6583_v25  ;;  %6350 = vmatmul.mubr.msk.f32.vlgmr.msra.gmra.mrb[36].mxu0 %vm144_vm3, %v3122_v14  ;;  %v3537_v12 = vld [vmem:[%s7739_s7 + $0x40] sm:$0xff]  ;;  %v3530_v14 = vld [vmem:[%s7739_s7 + $0x8] sm:$0xff] }
 0xde4   :  { %6359 = vmatprep.mubr.msk.f32.mxu0 %vm6639_vm2, %v6638_v9 }
 0xde5   :  { %6335 = vmatmul.mubr.msk.f32.vlgmr.msra.gmra.mrb[34].mxu1 %vm298_vm4, %v2806_v34  ;;  %v5716_v34 = vcombine.high %v3529_v33, %v3537_v12 }
 0xde6   :  { %6343 = vmatpush3.xpose.msk.msra.mxu1 %vm144_vm3, %v3046_v28  ;;  %6344 = vmatprep.mubr.msk.f32.mxu1 %vm6639_vm2, %v6638_v9 }
 0xde7   :  { %6352 = vmatprep.subr.msk.mxu1 %vm330_vm1, %v3223_v35 }
 0xde9   :  { %6345 = vmatmul.mubr.msk.f32.vlgmr.msra.gmra.mrb[36].mxu1 %vm144_vm3, %v3044_v31 }
 0xdea   :  { %6354 = vmatprep.mubr.msk.f32.mxu1 %vm144_vm3, %v3225_v36  ;;  %6353 = vmatpush3.msk.msra.mxu1 %vm330_vm1, %v3223_v35  ;;  %v3538_v35 = vld [vmem:[%s7739_s7 + $0x48] sm:$0xff]  ;;  %v5715_v36 = vcombine.low %v3529_v33, %v3537_v12 }
 0xdeb   :  { %6362 = vmatprep.subr.mxu1 %v6638_v9 }
 0xded   :  { %6355 = vmatmul.mubr.msk.f32.vlgmr.msra.gmra.mrb[38].mxu1 %vm144_vm3, %v3227_v37  ;;  %v5717_v37 = vcombine.low %v3530_v14, %v3538_v35 }
 0xdee   :  { %6364 = vmatprep.mubr.msk.f32.mxu1 %vm6639_vm2, %v6638_v9 }
 0xeb2   :  { %v3037_v38 = vpop.f32.mrb[34].mxu0 }
 0xeb3   :  { %v3042_v39 = vadd.f32 %v3037_v38, %v7034_v63  ;;  %v6341_v40 = vpop.f32.mrb[35].mxu0  ;;  %v5718_v38 = vcombine.high %v3530_v14, %v3538_v35  ;;  %v3549_v14 = vld [vmem:[%s7739_s7 + $0xa0] sm:$0xff]  ;;  %v3550_v35 = vld [vmem:[%s7739_s7 + $0xa8] sm:$0xff] }
 0xeb4   :  { %v3553_v40 = vld [vmem:[%s7739_s7 + $0xc0] sm:$0xff] }
 0xeb6   :  { %v3195_v41 = vpop.f32.mrb[36].mxu0 }
 0xeb7   :  { %v3200_v42 = vmul.f32 0.5, %v3195_v41  ;;  %v6351_v43 = vpop.f32.mrb[37].mxu0  ;;  %v3546_v41 = vld [vmem:[%s7739_s7 + $0x88] sm:$0xff] }
 0xeb8   :  { %v2964_v44 = vpop.f32.mrb[34].mxu1 }
 0xeb9   :  { %v3041_v45 = vadd.f32 %v2964_v44, %v7037_v5  ;;  %v6336_v46 = vpop.f32.mrb[35].mxu1  ;;  %v3204_v47 = vsel %vm298_vm4, %v3200_v42, -inf  ;;  %v3554_v44 = vld [vmem:[%s7739_s7 + $0xc8] sm:$0xff] }
 0xeba   :  { %3205 = vmax.xlane.f32.xlu1 %v3204_v47  ;;  %v5733_v46 = vcombine.low %v3546_v41, %v3554_v44  ;;  %v5734_v47 = vcombine.high %v3546_v41, %v3554_v44  ;;  %v3535_v41 = vld [vmem:[%s7739_s7 + $0x30] sm:$0xff]  ;;  %v3544_v44 = vld [vmem:[%s7739_s7 + $0x78] sm:$0xff] }
 0xebc   :  { %v3117_v48 = vpop.f32.mrb[36].mxu1 }
 0xebd   :  { %v3199_v49 = vmul.f32 0.5, %v3117_v48  ;;  %v6346_v50 = vpop.f32.mrb[37].mxu1  ;;  %v3531_v48 = vld [vmem:[%s7739_s7 + $0x10] sm:$0xff] }
 0xebe   :  { %v3532_v50 = vld [vmem:[%s7739_s7 + $0x18] sm:$0xff] }
 0xebf   :  { %v3201_v51 = vsel %vm298_vm4, %v3199_v49, -inf }
 0xec0   :  { %3202 = vmax.xlane.f32.xlu0 %v3201_v51  ;;  %v6356_v9 = vpop.f32.mrb[38].mxu1 }
 0xec1   :  { %v3301_v52 = vpop.f32.mrb[39].mxu1  ;;  %6363 = vmatpush3.msra.mxu1 %v6356_v9  ;;  %v3540_v9 = vld [vmem:[%s7739_s7 + $0x58] sm:$0xff] }
 0xec2   :  { %6358 = vmatpush3.msra.mxu0 %v3301_v52  ;;  %3851 = vmatprep.subr.bf16.mxu1 %v5718_v38 }
 0xec3   :  { %3808 = vmatprep.subr.bf16.mxu0 %v5716_v34  ;;  %v3557_v34 = vld [vmem:[%s7739_s7 + $0xe0] sm:$0xff] }
 0xf47   :  { %v3206_v53 = vpop.xlane.xlu1 %3205 }
 0xf48   :  { %v3208_v54 = vsub.f32 %v3200_v42, %v3206_v53  ;;  %v5721_v53 = vcombine.low %v3532_v50, %v3540_v9 }
 0xf4a   :  { %v3211_v57 = vmul.f32 1.442695, %v3208_v54  ;;  %v5722_v54 = vcombine.high %v3532_v50, %v3540_v9  ;;  %v3551_v50 = vld [vmem:[%s7739_s7 + $0xb0] sm:$0xff]  ;;  %v3552_v9 = vld [vmem:[%s7739_s7 + $0xb8] sm:$0xff] }
 0xf4d   :  { %v3203_v55 = vpop.xlane.xlu0 %3202 }
 0xf4e   :  { %v3207_v56 = vsub.f32 %v3199_v49, %v3203_v55  ;;  %v3539_v49 = vld [vmem:[%s7739_s7 + $0x50] sm:$0xff] }
 0xf4f   :  { %v5720_v51 = vcombine.high %v3531_v48, %v3539_v49  ;;  %v5719_v52 = vcombine.low %v3531_v48, %v3539_v49 }
 0xf50   :  { %v3209_v58 = vmul.f32 1.442695, %v3207_v56 }
 0xf52   :  { %6588 = vpow2.f32 %v3209_v58 }
 0xf53   :  { %6590 = vpow2.f32 %v3211_v57 }
 0xf5c   :  { %v6589_v59 = vpop.eup %6588 }
 0xf5d   :  { %v3213_v60 = vsel %vm298_vm4, %v6589_v59, 0.0  ;;  %v6591_v61 = vpop.eup %6590 }
 0xf5e   :  { %3214 = vadd.xlane.f32.xlu0 %v3213_v60  ;;  %v3216_v62 = vsel %vm298_vm4, %v6591_v61, 0.0 }
 0xf62   :  { %3217 = vadd.xlane.f32.xlu0 %v3216_v62 }
 0xfeb   :  { %v3215_v63 = vpop.xlane.xlu0 %3214 }
 0xfec   :  { %6592 = vrcp.f32 %v3215_v63 }
 0xfef   :  { %v3218_v0 = vpop.xlane.xlu0 %3217 }
 0xff0   :  { %6594 = vrcp.f32 %v3218_v0 }
 0xff6   :  { %v6593_v1 = vpop.eup %6592 }
 0xff7   :  { %v3221_v2 = vmul.f32 %v6593_v1, %v6589_v59 }
 0xff9   :  { %6360 = vmatmul.mubr.msk.f32.vlgmr.msra.gmra.mrb[38].mxu0 %vm298_vm4, %v3221_v2 }
 0xffa   :  { %v6595_v3 = vpop.eup %6594  ;;  %3809 = vmatpush1.bf16.msra.mxu0 %v5715_v36  ;;  %v3558_v36 = vld [vmem:[%s7739_s7 + $0xe8] sm:$0xff] }
 0xffb   :  { %v3222_v4 = vmul.f32 %v6595_v3, %v6591_v61 }
 0xffd   :  { %6365 = vmatmul.mubr.msk.f32.vlgmr.msra.gmra.mrb[40].mxu1 %vm298_vm4, %v3222_v4 }
 0xffe   :  { %3852 = vmatpush1.bf16.msra.mxu1 %v5717_v37 }
 0xfff   :  { %3853 = vmatprep.subr.bf16.mxu1 %v5734_v47  ;;  %v5741_v47 = vcombine.low %v3550_v35, %v3558_v36 }
0x1002   :  { %3854 = vmatpush1.bf16.msra.mxu1 %v5733_v46  ;;  %v5739_v46 = vcombine.low %v3549_v14, %v3557_v34 }
0x1003   :  { %3937 = vmatprep.subr.bf16.mxu1 %v5722_v54 }
0x10cc   :  { %v3379_v5 = vpop.f32.mrb[38].mxu0 }
0x10cd   :  { %v3456_v7 = vadd.f32 %v3379_v5, %v3041_v45  ;;  %v6361_v8 = vpop.f32.mrb[39].mxu0  ;;  %v6663_v45 = vmov 0  }
0x10ce   :  { %3840 = vmatprep.mubr.bf16.mxu0 %v6663_v45  ;;  %3883 = vmatprep.mubr.bf16.mxu1 %v6663_v45 }
0x10cf   :  { %v3465_v10 = vadd.f32 %v5712_v6, %v3456_v7  ;;  %v5713_v7 = vld [vmem:[%s7737_s5] ss:$0 sm:$0xff] }
0x10d0   :  { %v3452_v11 = vpop.f32.mrb[40].mxu1 }
0x10d1   :  { %v3457_v13 = vadd.f32 %v3452_v11, %v3042_v39  ;;  %v6366_v15 = vpop.f32.mrb[41].mxu1  ;;  %v3467_v17 = vadd.f32 %v6612_v16, %v3465_v10  ;;  %v3545_v39 = vld [vmem:[%s7739_s7 + $0x80] sm:$0xff] }
0x10d2   :  { %v5731_v42 = vcombine.low %v3545_v39, %v3553_v40  ;;  %v5732_v43 = vcombine.high %v3545_v39, %v3553_v40  ;;  %v5714_v16 = vld [vmem:[%s7738_s6] ss:$0 sm:$0xff]  ;;  %v5740_v39 = vcombine.high %v3549_v14, %v3557_v34  ;;  %v5742_v40 = vcombine.high %v3550_v35, %v3558_v36  ;;  %v7347_v34 = vld [vmem:[%s7740_s8 + $0x8] sm:$0xff] }
0x10d3   :  { %v3466_v18 = vadd.f32 %v5712_v6, %v3457_v13  ;;  %v3469_v19 = vsel %vm59_vm0, %v3467_v17, 0.0 }
0x10d4   :  { %3470 = vadd.xlane.f32.xlu1 %v3469_v19  ;;  %3810 = vmatprep.subr.bf16.mxu0 %v5732_v43  ;;  %v3555_v19 = vld [vmem:[%s7739_s7 + $0xd0] sm:$0xff]  ;;  %v3536_v43 = vld [vmem:[%s7739_s7 + $0x38] sm:$0xff] }
0x10d5   :  { %v3468_v21 = vadd.f32 %v6613_v20, %v3466_v18  ;;  %3811 = vmatpush1.bf16.msra.mxu0 %v5731_v42  ;;  %v3547_v18 = vld [vmem:[%s7739_s7 + $0x90] sm:$0xff]  ;;  %v3548_v20 = vld [vmem:[%s7739_s7 + $0x98] sm:$0xff]  ;;  %v5730_v49 = vcombine.high %v3536_v43, %v3544_v44  ;;  %v5729_v54 = vcombine.low %v3536_v43, %v3544_v44 }
0x10d6   :  { %3894 = vmatprep.subr.bf16.mxu0 %v5720_v51  ;;  %v3543_v42 = vld [vmem:[%s7739_s7 + $0x70] sm:$0xff] }
0x10d7   :  { %v3472_v22 = vsel %vm59_vm0, %v3468_v21, 0.0  ;;  %v5728_v48 = vcombine.high %v3535_v41, %v3543_v42  ;;  %v3559_v51 = vld [vmem:[%s7739_s7 + $0xf0] sm:$0xff] }
0x10d8   :  { %3473 = vadd.xlane.f32.xlu0 %v3472_v22 }
0x1161   :  { %v3471_v23 = vpop.xlane.xlu1 %3470 }
0x1162   :  { %v3476_v24 = vmul.f32 0.03125, %v3471_v23 }
0x1164   :  { %v7093_v25 = vsub.f32 %v3467_v17, %v3476_v24 }
0x1165   :  { %v3474_v26 = vpop.xlane.xlu0 %3473 }
0x1166   :  { %v3477_v27 = vmul.f32 0.03125, %v3474_v26  ;;  %v3480_v28 = vmul.f32 %v7093_v25, %v7093_v25  ;;  %v3515_v10 = vmul.f32 %v5713_v7, %v7093_v25  ;;  %v5736_v25 = vcombine.high %v3547_v18, %v3555_v19 }
0x1168   :  { %v7097_v29 = vsub.f32 %v3468_v21, %v3477_v27  ;;  %v3482_v30 = vsel %vm59_vm0, %v3480_v28, 0.0  ;;  %v3556_v21 = vld [vmem:[%s7739_s7 + $0xd8] sm:$0xff]  ;;  %v3533_v27 = vld [vmem:[%s7739_s7 + $0x20] sm:$0xff] }
0x1169   :  { %3483 = vadd.xlane.f32.xlu1 %v3482_v30  ;;  %v5738_v26 = vcombine.high %v3548_v20, %v3556_v21  ;;  %v3541_v28 = vld [vmem:[%s7739_s7 + $0x60] sm:$0xff]  ;;  %v3542_v30 = vld [vmem:[%s7739_s7 + $0x68] sm:$0xff] }
0x116a   :  { %v3481_v31 = vmul.f32 %v7097_v29, %v7097_v29  ;;  %v3516_v11 = vmul.f32 %v5713_v7, %v7097_v29  ;;  %v3534_v29 = vld [vmem:[%s7739_s7 + $0x28] sm:$0xff]  ;;  %v5724_v33 = vcombine.high %v3533_v27, %v3541_v28  ;;  %v5723_v37 = vcombine.low %v3533_v27, %v3541_v28  ;;  %v6417_v7 = vld [vmem:[%s7741_s9 + $0xd8] sm:$0xff]  }
0x116b   :  { %v5726_v12 = vcombine.high %v3534_v29, %v3542_v30  ;;  %v5725_v38 = vcombine.low %v3534_v29, %v3542_v30  ;;  %v6432_v27 = vld [vmem:[%s7741_s9 + $0x78] sm:$0xff]  }
0x116c   :  { %v3485_v32 = vsel %vm59_vm0, %v3481_v31, 0.0  ;;  %v5735_v31 = vcombine.low %v3547_v18, %v3555_v19  ;;  %v6425_v18 = vld [vmem:[%s7741_s9 + $0xe8] sm:$0xff]   ;;  %v6433_v28 = vld [vmem:[%s7741_s9 + $0xf8] sm:$0xff]  }
0x116d   :  { %3486 = vadd.xlane.f32.xlu0 %v3485_v32  ;;  %v5737_v32 = vcombine.low %v3548_v20, %v3556_v21  ;;  %v6426_v19 = vld [vmem:[%s7741_s9 + $0x28] sm:$0xff]   ;;  %v6428_v21 = vld [vmem:[%s7741_s9 + $0x70] sm:$0xff]   ;;  %v6434_v29 = vld [vmem:[%s7741_s9 + $0x38] sm:$0xff]  }
0x116e   :  { %v6427_v20 = vld [vmem:[%s7741_s9 + $0xa8] sm:$0xff]   ;;  %v6435_v30 = vld [vmem:[%s7741_s9 + $0xb8] sm:$0xff]  }
0x11f6   :  { %v3484_v55 = vpop.xlane.xlu1 %3483 }
0x11f7   :  { %v3488_v56 = vmul.f32 0.032258064, %v3484_v55  ;;  %v5744_v55 = vcombine.high %v3551_v50, %v3559_v51 }
0x11f9   :  { %6596 = vrsqrt.f32 %v3488_v56  ;;  %vm3492_vm5 = vcmp.eq.f32.partialorder %v3488_v56, inf  ;;  %v3495_v61 = vand.u32 2147483648, %v3488_v56  ;;  %vm3494_vm6 = vcmp.eq.f32.partialorder %v3488_v56, 0.0 }
0x11fa   :  { %v3487_v57 = vpop.xlane.xlu0 %3486 }
0x11fb   :  { %v3489_v58 = vmul.f32 0.032258064, %v3487_v57  ;;  %v5743_v57 = vcombine.low %v3551_v50, %v3559_v51 }
0x11fd   :  { %6598 = vrsqrt.f32 %v3489_v58  ;;  %vm3499_vm7 = vcmp.eq.f32.partialorder %v3489_v58, inf  ;;  %v3502_v3 = vand.u32 2147483648, %v3489_v58  ;;  %vm3501_vm8 = vcmp.eq.f32.partialorder %v3489_v58, 0.0 }
0x1203   :  { %v6597_v59 = vpop.eup %6596 }
0x1204   :  { %v3491_v60 = vmul.f32 %v6597_v59, %v3488_v56  ;;  %v6404_v59 = vld [vmem:[%s7741_s9 + $0x40] sm:$0xff]  }
0x1206   :  { %v3493_v62 = vsel %vm3492_vm5, %v3488_v56, %v3491_v60  ;;  %v6405_v60 = vld [vmem:[%s7741_s9 + $0xc0] sm:$0xff]  }
0x1207   :  { %v6599_v63 = vpop.eup %6598  ;;  %v3496_v0 = vsel %vm3494_vm6, %v3495_v61, %v3493_v62  ;;  %v6406_v61 = vld [vmem:[%s7741_s9] sm:$0xff]  }
0x1208   :  { %v3504_v1 = vadd.f32 1e-06, %v3496_v0  ;;  %v3498_v2 = vmul.f32 %v6599_v63, %v3489_v58  ;;  %v6407_v62 = vld [vmem:[%s7741_s9 + $0x80] sm:$0xff]   ;;  %v6408_v63 = vld [vmem:[%s7741_s9 + $0x48] sm:$0xff]  }
0x1209   :  { %v6410_v0 = vld [vmem:[%s7741_s9 + $0x8] sm:$0xff]  }
0x120a   :  { %6600 = vrcp.f32 %v3504_v1  ;;  %v3500_v4 = vsel %vm3499_vm7, %v3489_v58, %v3498_v2  ;;  %v6411_v1 = vld [vmem:[%s7741_s9 + $0x88] sm:$0xff]   ;;  %v6412_v2 = vld [vmem:[%s7741_s9 + $0x50] sm:$0xff]  }
0x120b   :  { %v3503_v5 = vsel %vm3501_vm8, %v3502_v3, %v3500_v4  ;;  %v6413_v3 = vld [vmem:[%s7741_s9 + $0xd0] sm:$0xff]  }
0x120c   :  { %v3505_v6 = vadd.f32 1e-06, %v3503_v5  ;;  %v6414_v4 = vld [vmem:[%s7741_s9 + $0x10] sm:$0xff]  }
0x120d   :  { %v6415_v5 = vld [vmem:[%s7741_s9 + $0x90] sm:$0xff]  }
0x120e   :  { %6602 = vrcp.f32 %v3505_v6  ;;  %v6416_v6 = vld [vmem:[%s7741_s9 + $0x58] sm:$0xff]  }
0x1214   :  { %v6601_v8 = vpop.eup %6600 }
0x1215   :  { %v3517_v13 = vmul.f32 %v6601_v8, %v3515_v10  ;;  %v6418_v8 = vld [vmem:[%s7741_s9 + $0x18] sm:$0xff]  }
0x1216   :  { %v6419_v10 = vld [vmem:[%s7741_s9 + $0x98] sm:$0xff]  }
0x1217   :  { %v7161_v22 = vadd.f32 %v5714_v16, %v3517_v13  ;;  %v6421_v13 = vld [vmem:[%s7741_s9 + $0xe0] sm:$0xff]  }
0x1218   :  { %v6603_v15 = vpop.eup %6602 }
0x1219   :  { %v3518_v17 = vmul.f32 %v6603_v15, %v3516_v11  ;;  %v6420_v11 = vld [vmem:[%s7741_s9 + $0x60] sm:$0xff]  }
0x121a   :  { %v6422_v15 = vld [vmem:[%s7741_s9 + $0x20] sm:$0xff]  }
0x121b   :  { %v7163_v23 = vadd.f32 %v5714_v16, %v3518_v17  ;;  %v6423_v16 = vld [vmem:[%s7741_s9 + $0xa0] sm:$0xff]   ;;  %v6424_v17 = vld [vmem:[%s7741_s9 + $0x68] sm:$0xff]  }
0x121d   :  { %v7167_v24 = vpack.c.bf16 %v7163_v23, %v7161_v22 }
0x121f   :  { %5747 = vmatmul.mubr.msk.bf16.vlgmr.msra.gmra.mrb[40].mxu0 %vm59_vm0, %v7167_v24  ;;  %5748 = vmatmul.mubr.msk.bf16.vlgmr.msra.gmra.mrb[44].mxu1 %vm59_vm0, %v7167_v24 }
0x1220   :  { %3895 = vmatpush1.bf16.msra.mxu0 %v5719_v52  ;;  %3938 = vmatpush1.bf16.msra.mxu1 %v5721_v53  ;;  %v3560_v52 = vld [vmem:[%s7739_s7 + $0xf8] sm:$0xff]  ;;  %v5727_v53 = vcombine.low %v3535_v41, %v3543_v42 }
0x1221   :  { %3896 = vmatprep.subr.bf16.mxu0 %v5736_v25  ;;  %3939 = vmatprep.subr.bf16.mxu1 %v5738_v26  ;;  %v5746_v56 = vcombine.high %v3552_v9, %v3560_v52  ;;  %v5745_v58 = vcombine.low %v3552_v9, %v3560_v52  ;;  %v6430_v25 = vld [vmem:[%s7741_s9 + $0x30] sm:$0xff]  }
0x1222   :  { %3926 = vmatprep.mubr.bf16.mxu0 %v6663_v45  ;;  %3969 = vmatprep.mubr.bf16.mxu1 %v6663_v45  ;;  %v6431_v26 = vld [vmem:[%s7741_s9 + $0xb0] sm:$0xff]  }
0x1224   :  { %3897 = vmatpush1.bf16.msra.mxu0 %v5735_v31  ;;  %3940 = vmatpush1.bf16.msra.mxu1 %v5737_v32  ;;  %v6436_v31 = vld [vmem:[%s7741_s9 + $0x140] sm:$0xff]  }
0x1225   :  { %3980 = vmatprep.subr.bf16.mxu0 %v5724_v33  ;;  %4023 = vmatprep.subr.bf16.mxu1 %v5726_v12  ;;  %v6437_v32 = vld [vmem:[%s7741_s9 + $0x1c0] sm:$0xff]   ;;  %v3565_v33 = vlaneseq }
0x1227   :  { %5749 = vmatmul.mubr.msk.bf16.vlgmr.msra.gmra.mrb[44].mxu0 %vm59_vm0, %v7167_v24  ;;  %5750 = vmatmul.mubr.msk.bf16.vlgmr.msra.gmra.mrb[48].mxu1 %vm59_vm0, %v7167_v24  ;;  %v7341_v12 = vshrl.u32 %v3565_v33, 7 }
0x1228   :  { %3981 = vmatpush1.bf16.msra.mxu0 %v5723_v37  ;;  %4024 = vmatpush1.bf16.msra.mxu1 %v5725_v38  ;;  %v3561_v38 = vld [vmem:[%s7740_s8] sm:$0xff] }
0x1229   :  { %3982 = vmatprep.subr.bf16.mxu0 %v5740_v39  ;;  %4025 = vmatprep.subr.bf16.mxu1 %v5742_v40  ;;  %v3591_v14 = vsub.s32 6, %v7341_v12  ;;  %v3567_v36 = vsub.s32 0, %v7341_v12  ;;  %v3575_v37 = vsub.s32 2, %v7341_v12  ;;  %v3571_v39 = vsub.s32 1, %v7341_v12 }
0x122a   :  { %4012 = vmatprep.mubr.bf16.mxu0 %v6663_v45  ;;  %4055 = vmatprep.mubr.bf16.mxu1 %v6663_v45  ;;  %v3579_v40 = vsub.s32 3, %v7341_v12  ;;  %v3595_v50 = vsub.s32 7, %v7341_v12 }
0x122b   :  { %v7350_v35 = vrot.slane %v7347_v34, %v3591_v14  ;;  %v3568_v41 = vrot.slane %v3561_v38, %v3567_v36  ;;  %v3576_v42 = vrot.slane %v3561_v38, %v3575_v37  ;;  %v3572_v43 = vrot.slane %v3561_v38, %v3571_v39 }
0x122c   :  { %3983 = vmatpush1.bf16.msra.mxu0 %v5739_v46  ;;  %4026 = vmatpush1.bf16.msra.mxu1 %v5741_v47  ;;  %v3580_v44 = vrot.slane %v3561_v38, %v3579_v40  ;;  %v3583_v46 = vsub.s32 4, %v7341_v12 }
0x122d   :  { %4066 = vmatprep.subr.bf16.mxu0 %v5728_v48  ;;  %4109 = vmatprep.subr.bf16.mxu1 %v5730_v49  ;;  %v3587_v49 = vsub.s32 5, %v7341_v12 }
0x122f   :  { %5751 = vmatmul.mubr.msk.bf16.vlgmr.msra.gmra.mrb[48].mxu0 %vm59_vm0, %v7167_v24  ;;  %5752 = vmatmul.mubr.msk.bf16.vlgmr.msra.gmra.mrb[52].mxu1 %vm59_vm0, %v7167_v24 }
0x1230   :  { %4067 = vmatpush1.bf16.msra.mxu0 %v5727_v53  ;;  %4110 = vmatpush1.bf16.msra.mxu1 %v5729_v54 }
0x1231   :  { %4068 = vmatprep.subr.bf16.mxu0 %v5744_v55  ;;  %4111 = vmatprep.subr.bf16.mxu1 %v5746_v56 }
0x1232   :  { %4098 = vmatprep.mubr.bf16.mxu0 %v6663_v45  ;;  %4141 = vmatprep.mubr.bf16.mxu1 %v6663_v45  ;;  %v6409_v45 = vld [vmem:[%s7741_s9 + $0xc8] sm:$0xff]  }
0x1234   :  { %4069 = vmatpush1.bf16.msra.mxu0 %v5743_v57  ;;  %4112 = vmatpush1.bf16.msra.mxu1 %v5745_v58 }
0x1235   :  { %5980 = vmatprep.subr.bf16.mxu0 %v6404_v59  ;;  %6002 = vmatprep.subr.bf16.mxu1 %v6405_v60 }
0x1237   :  { %5753 = vmatmul.mubr.msk.bf16.vlgmr.msra.gmra.mrb[52].mxu0 %vm59_vm0, %v7167_v24  ;;  %5754 = vmatmul.mubr.msk.bf16.vlgmr.msra.gmra.mrb[56].mxu1 %vm59_vm0, %v7167_v24  ;;  %v6429_v24 = vld [vmem:[%s7741_s9 + $0xf0] sm:$0xff]  }
0x1238   :  { %5981 = vmatpush3.bf16.msra.mxu0 %v6406_v61  ;;  %6003 = vmatpush3.bf16.msra.mxu1 %v6407_v62  ;;  %v3584_v62 = vrot.slane %v3561_v38, %v3583_v46 }
0x1239   :  { %5982 = vmatprep.subr.bf16.mxu0 %v6408_v63  ;;  %6004 = vmatprep.subr.bf16.mxu1 %v6409_v45  ;;  %v3592_v63 = vrot.slane %v3561_v38, %v3591_v14 }
0x123c   :  { %5983 = vmatpush3.bf16.msra.mxu0 %v6410_v0  ;;  %6005 = vmatpush3.bf16.msra.mxu1 %v6411_v1  ;;  %v3588_v1 = vrot.slane %v3561_v38, %v3587_v49 }
0x123d   :  { %5984 = vmatprep.subr.bf16.mxu0 %v6412_v2  ;;  %6006 = vmatprep.subr.bf16.mxu1 %v6413_v3  ;;  %v3596_v2 = vrot.slane %v3561_v38, %v3595_v50  ;;  %v3608_v38 = vrot.slane %v7347_v34, %v3575_v37  ;;  %v6443_v37 = vld [vmem:[%s7741_s9 + $0x188] sm:$0xff]  }
0x1240   :  { %5985 = vmatpush3.bf16.msra.mxu0 %v6414_v4  ;;  %6007 = vmatpush3.bf16.msra.mxu1 %v6415_v5 }
0x1241   :  { %5986 = vmatprep.subr.bf16.mxu0 %v6416_v6  ;;  %6008 = vmatprep.subr.bf16.mxu1 %v6417_v7 }
0x1244   :  { %5987 = vmatpush3.bf16.msra.mxu0 %v6418_v8  ;;  %6009 = vmatpush3.bf16.msra.mxu1 %v6419_v10 }
0x1245   :  { %5988 = vmatprep.subr.bf16.mxu0 %v6420_v11  ;;  %6010 = vmatprep.subr.bf16.mxu1 %v6421_v13 }
0x1248   :  { %5989 = vmatpush3.bf16.msra.mxu0 %v6422_v15  ;;  %6011 = vmatpush3.bf16.msra.mxu1 %v6423_v16 }
0x1249   :  { %5990 = vmatprep.subr.bf16.mxu0 %v6424_v17  ;;  %6012 = vmatprep.subr.bf16.mxu1 %v6425_v18 }
0x124c   :  { %5991 = vmatpush3.bf16.msra.mxu0 %v6426_v19  ;;  %6013 = vmatpush3.bf16.msra.mxu1 %v6427_v20  ;;  %v6438_v20 = vld [vmem:[%s7741_s9 + $0x100] sm:$0xff]  }
0x124d   :  { %5992 = vmatprep.subr.bf16.mxu0 %v6428_v21  ;;  %6014 = vmatprep.subr.bf16.mxu1 %v6429_v24  ;;  %v6439_v21 = vld [vmem:[%s7741_s9 + $0x180] sm:$0xff]  }
0x1250   :  { %5993 = vmatpush3.bf16.msra.mxu0 %v6430_v25  ;;  %6015 = vmatpush3.bf16.msra.mxu1 %v6431_v26 }
0x1251   :  { %5994 = vmatprep.subr.bf16.mxu0 %v6432_v27  ;;  %6016 = vmatprep.subr.bf16.mxu1 %v6433_v28  ;;  %v6440_v28 = vld [vmem:[%s7741_s9 + $0x148] sm:$0xff]  }
0x1254   :  { %5995 = vmatpush3.bf16.msra.mxu0 %v6434_v29  ;;  %6017 = vmatpush3.bf16.msra.mxu1 %v6435_v30  ;;  %v6441_v29 = vld [vmem:[%s7741_s9 + $0x1c8] sm:$0xff]   ;;  %v3600_v30 = vrot.slane %v7347_v34, %v3567_v36 }
0x1255   :  { %6024 = vmatprep.subr.bf16.mxu0 %v6436_v31  ;;  %6046 = vmatprep.subr.bf16.mxu1 %v6437_v32 }
0x12f2   :  { %v3842_v47 = vpop.f32.mrb[40].mxu0  ;;  %v3885_v48 = vpop.f32.mrb[44].mxu1 }
0x12f3   :  { %v3843_v51 = vadd.f32 %v3842_v47, %v3568_v41  ;;  %v3886_v9 = vadd.f32 %v3885_v48, %v3576_v42  ;;  %v3844_v52 = vpop.f32.mrb[41].mxu0  ;;  %v3887_v53 = vpop.f32.mrb[45].mxu1  ;;  %v3604_v47 = vrot.slane %v7347_v34, %v3571_v39 }
0x12f4   :  { %v3845_v54 = vadd.f32 %v3844_v52, %v3572_v43  ;;  %v3888_v55 = vadd.f32 %v3887_v53, %v3580_v44  ;;  %v3846_v56 = vpop.f32.mrb[42].mxu0  ;;  %v3889_v57 = vpop.f32.mrb[46].mxu1 }
0x12f5   :  { %v3847_v58 = vadd.f32 %v3846_v56, %v3568_v41  ;;  %v3890_v59 = vadd.f32 %v3889_v57, %v3576_v42  ;;  %v3848_v60 = vpop.f32.mrb[43].mxu0  ;;  %v3891_v61 = vpop.f32.mrb[47].mxu1  ;;  %v4152_v3 = vmax.f32 %v3843_v51, 0.0  ;;  %v4154_v4 = vmax.f32 %v3886_v9, 0.0  ;;  %v6442_v51 = vld [vmem:[%s7741_s9 + $0x108] sm:$0xff]   ;;  %v6445_v56 = vld [vmem:[%s7741_s9 + $0x1d0] sm:$0xff]  }
0x12f6   :  { %v3849_v45 = vadd.f32 %v3848_v60, %v3572_v43  ;;  %v3892_v0 = vadd.f32 %v3891_v61, %v3580_v44  ;;  %v4153_v7 = vmax.f32 %v3845_v54, 0.0  ;;  %v4155_v8 = vmax.f32 %v3888_v55, 0.0  ;;  %v6444_v55 = vld [vmem:[%s7741_s9 + $0x150] sm:$0xff]  }
0x12f7   :  { %v4168_v5 = vmax.f32 %v3847_v58, 0.0  ;;  %v4170_v6 = vmax.f32 %v3890_v59, 0.0  ;;  %v3612_v9 = vrot.slane %v7347_v34, %v3579_v40 }
0x12f8   :  { %v4169_v10 = vmax.f32 %v3849_v45, 0.0  ;;  %v4171_v11 = vmax.f32 %v3892_v0, 0.0 }
0x12f9   :  { %v4184_v13 = vpack.c.bf16 %v4168_v5, %v4152_v3  ;;  %v4186_v15 = vpack.c.bf16 %v4170_v6, %v4154_v4 }
0x12fa   :  { %v4185_v16 = vpack.c.bf16 %v4169_v10, %v4153_v7  ;;  %v4187_v17 = vpack.c.bf16 %v4171_v11, %v4155_v8  ;;  %v3928_v18 = vpop.f32.mrb[44].mxu0  ;;  %v3971_v19 = vpop.f32.mrb[48].mxu1  ;;  %v6448_v7 = vld [vmem:[%s7741_s9 + $0x158] sm:$0xff]  }
0x12fb   :  { %v3929_v24 = vadd.f32 %v3928_v18, %v3584_v62  ;;  %v3972_v25 = vadd.f32 %v3971_v19, %v3592_v63  ;;  %v3930_v26 = vpop.f32.mrb[45].mxu0  ;;  %v3973_v27 = vpop.f32.mrb[49].mxu1  ;;  %v6449_v8 = vld [vmem:[%s7741_s9 + $0x1d8] sm:$0xff]  }
0x12fc   :  { %v3931_v31 = vadd.f32 %v3930_v26, %v3588_v1  ;;  %v3974_v32 = vadd.f32 %v3973_v27, %v3596_v2  ;;  %v3932_v33 = vpop.f32.mrb[46].mxu0  ;;  %v3975_v14 = vpop.f32.mrb[50].mxu1  ;;  %5263 = vmatprep.mubr.bf16.mxu0 %v4185_v16  ;;  %5304 = vmatprep.mubr.bf16.mxu1 %v4187_v17  ;;  %v6450_v26 = vld [vmem:[%s7741_s9 + $0x118] sm:$0xff]  }
0x12fd   :  { %v3933_v41 = vadd.f32 %v3932_v33, %v3584_v62  ;;  %v3976_v42 = vadd.f32 %v3975_v14, %v3592_v63  ;;  %v3934_v43 = vpop.f32.mrb[47].mxu0  ;;  %v3977_v44 = vpop.f32.mrb[51].mxu1  ;;  %5264 = vmatmul.mubr.bf16.vlgmr.msra.gmra.mrb[56].mxu0 %v4184_v13  ;;  %5305 = vmatmul.mubr.bf16.vlgmr.msra.gmra.mrb[60].mxu1 %v4186_v15  ;;  %v4156_v52 = vmax.f32 %v3929_v24, 0.0  ;;  %v4158_v53 = vmax.f32 %v3972_v25, 0.0  ;;  %v6451_v27 = vld [vmem:[%s7741_s9 + $0x198] sm:$0xff]  }
0x12fe   :  { %v3935_v48 = vadd.f32 %v3934_v43, %v3588_v1  ;;  %v3978_v36 = vadd.f32 %v3977_v44, %v3596_v2  ;;  %6025 = vmatpush3.bf16.msra.mxu0 %v6438_v20  ;;  %6047 = vmatpush3.bf16.msra.mxu1 %v6439_v21  ;;  %v4157_v57 = vmax.f32 %v3931_v31, 0.0  ;;  %v4159_v58 = vmax.f32 %v3974_v32, 0.0  ;;  %v6446_v1 = vld [vmem:[%s7741_s9 + $0x110] sm:$0xff]   ;;  %v6452_v31 = vld [vmem:[%s7741_s9 + $0x160] sm:$0xff]  }
0x12ff   :  { %v4172_v54 = vmax.f32 %v3933_v41, 0.0  ;;  %v4174_v39 = vmax.f32 %v3976_v42, 0.0  ;;  %6026 = vmatprep.subr.bf16.mxu0 %v6440_v28  ;;  %6048 = vmatprep.subr.bf16.mxu1 %v6441_v29  ;;  %v6447_v2 = vld [vmem:[%s7741_s9 + $0x190] sm:$0xff]   ;;  %v3616_v20 = vrot.slane %v7347_v34, %v3583_v46  ;;  %v3620_v21 = vrot.slane %v7347_v34, %v3587_v49  ;;  %v6453_v32 = vld [vmem:[%s7741_s9 + $0x1e0] sm:$0xff]  }
0x1300   :  { %v4173_v59 = vmax.f32 %v3935_v48, 0.0  ;;  %v4175_v60 = vmax.f32 %v3978_v36, 0.0  ;;  %v3628_v46 = vrot.slane %v7347_v34, %v3595_v50  ;;  %v6455_v48 = vld [vmem:[%s7741_s9 + $0x1a0] sm:$0xff]  }
0x1301   :  { %v7404_v61 = vpack.c.bf16 %v4172_v54, %v4156_v52  ;;  %v7406_v40 = vpack.c.bf16 %v4174_v39, %v4158_v53  ;;  %v6456_v52 = vld [vmem:[%s7741_s9 + $0x168] sm:$0xff]  }
0x1302   :  { %v4189_v62 = vpack.c.bf16 %v4173_v59, %v4157_v57  ;;  %v4191_v63 = vpack.c.bf16 %v4175_v60, %v4159_v58  ;;  %6027 = vmatpush3.bf16.msra.mxu0 %v6442_v51  ;;  %6049 = vmatpush3.bf16.msra.mxu1 %v6443_v37  ;;  %v4014_v45 = vpop.f32.mrb[48].mxu0  ;;  %v4057_v0 = vpop.f32.mrb[52].mxu1  ;;  %v6457_v53 = vld [vmem:[%s7741_s9 + $0x1e8] sm:$0xff]  }
0x1303   :  { %v4015_v3 = vadd.f32 %v4014_v45, %v3600_v30  ;;  %v4058_v4 = vadd.f32 %v4057_v0, %v3608_v38  ;;  %v4016_v5 = vpop.f32.mrb[49].mxu0  ;;  %v4059_v6 = vpop.f32.mrb[53].mxu1  ;;  %6028 = vmatprep.subr.bf16.mxu0 %v6444_v55  ;;  %6050 = vmatprep.subr.bf16.mxu1 %v6445_v56  ;;  %v6458_v45 = vld [vmem:[%s7741_s9 + $0x128] sm:$0xff]  }
0x1304   :  { %v4017_v10 = vadd.f32 %v4016_v5, %v3604_v47  ;;  %v4060_v11 = vadd.f32 %v4059_v6, %v3612_v9  ;;  %v4018_v13 = vpop.f32.mrb[50].mxu0  ;;  %v4061_v15 = vpop.f32.mrb[54].mxu1  ;;  %5345 = vmatprep.mubr.bf16.mxu0 %v4189_v62  ;;  %5386 = vmatprep.mubr.bf16.mxu1 %v4191_v63  ;;  %v6459_v0 = vld [vmem:[%s7741_s9 + $0x1a8] sm:$0xff]   ;;  %v6461_v5 = vld [vmem:[%s7741_s9 + $0x1f0] sm:$0xff]  }
0x1305   :  { %v4019_v16 = vadd.f32 %v4018_v13, %v3600_v30  ;;  %v4062_v17 = vadd.f32 %v4061_v15, %v3608_v38  ;;  %v4020_v18 = vpop.f32.mrb[51].mxu0  ;;  %v4063_v19 = vpop.f32.mrb[55].mxu1  ;;  %v4160_v28 = vmax.f32 %v4015_v3, 0.0  ;;  %v4162_v29 = vmax.f32 %v4058_v4, 0.0 }
0x1306   :  { %v4021_v24 = vadd.f32 %v4020_v18, %v3604_v47  ;;  %v4064_v25 = vadd.f32 %v4063_v19, %v3612_v9  ;;  %6029 = vmatpush3.bf16.msra.mxu0 %v6446_v1  ;;  %6051 = vmatpush3.bf16.msra.mxu1 %v6447_v2  ;;  %v4161_v33 = vmax.f32 %v4017_v10, 0.0  ;;  %v4163_v14 = vmax.f32 %v4060_v11, 0.0  ;;  %v6454_v47 = vld [vmem:[%s7741_s9 + $0x120] sm:$0xff]   ;;  %v6463_v18 = vld [vmem:[%s7741_s9 + $0x1b0] sm:$0xff]   ;;  %v6464_v19 = vld [vmem:[%s7741_s9 + $0x178] sm:$0xff]  }
0x1307   :  { %v4176_v30 = vmax.f32 %v4019_v16, 0.0  ;;  %v4178_v49 = vmax.f32 %v4062_v17, 0.0  ;;  %6030 = vmatprep.subr.bf16.mxu0 %v6448_v7  ;;  %6052 = vmatprep.subr.bf16.mxu1 %v6449_v8  ;;  %v6462_v17 = vld [vmem:[%s7741_s9 + $0x130] sm:$0xff]  }
0x1308   :  { %v4177_v38 = vmax.f32 %v4021_v24, 0.0  ;;  %v4179_v12 = vmax.f32 %v4064_v25, 0.0  ;;  %v6467_v24 = vld [vmem:[%s7741_s9 + $0x1b8] sm:$0xff]   ;;  %v6468_v25 = vld [vmem:[%s7741_s9 + $0x240] sm:$0xff]  }
0x1309   :  { %v7441_v41 = vpack.c.bf16 %v4176_v30, %v4160_v28  ;;  %v7443_v34 = vpack.c.bf16 %v4178_v49, %v4162_v29  ;;  %v6472_v28 = vld [vmem:[%s7741_s9 + $0x248] sm:$0xff]  }
0x130a   :  { %v7445_v50 = vpack.c.bf16 %v4177_v38, %v4161_v33  ;;  %v7447_v42 = vpack.c.bf16 %v4179_v12, %v4163_v14  ;;  %6031 = vmatpush3.bf16.msra.mxu0 %v6450_v26  ;;  %6053 = vmatpush3.bf16.msra.mxu1 %v6451_v27  ;;  %v4100_v43 = vpop.f32.mrb[52].mxu0  ;;  %v4143_v44 = vpop.f32.mrb[56].mxu1  ;;  %v6469_v26 = vld [vmem:[%s7741_s9 + $0x2c0] sm:$0xff]   ;;  %v6473_v29 = vld [vmem:[%s7741_s9 + $0x2c8] sm:$0xff]   ;;  %v6480_v33 = vld [vmem:[%s7741_s9 + $0x258] sm:$0xff]  }
0x130b   :  { %v4101_v36 = vadd.f32 %v4100_v43, %v3616_v20  ;;  %v4144_v51 = vadd.f32 %v4143_v44, %v7350_v35  ;;  %v4102_v37 = vpop.f32.mrb[53].mxu0  ;;  %v4145_v9 = vpop.f32.mrb[57].mxu1  ;;  %6032 = vmatprep.subr.bf16.mxu0 %v6452_v31  ;;  %6054 = vmatprep.subr.bf16.mxu1 %v6453_v32  ;;  %v6470_v27 = vld [vmem:[%s7741_s9 + $0x200] sm:$0xff]   ;;  %v6474_v30 = vld [vmem:[%s7741_s9 + $0x208] sm:$0xff]   ;;  %v6478_v31 = vld [vmem:[%s7741_s9 + $0x210] sm:$0xff]  }
0x130c   :  { %v4103_v54 = vadd.f32 %v4102_v37, %v3620_v21  ;;  %v4146_v39 = vadd.f32 %v4145_v9, %v3628_v46  ;;  %v4104_v55 = vpop.f32.mrb[54].mxu0  ;;  %v4147_v56 = vpop.f32.mrb[58].mxu1  ;;  %v6475_v49 = vld [vmem:[%s7741_s9 + $0x288] sm:$0xff]   ;;  %v6479_v32 = vld [vmem:[%s7741_s9 + $0x290] sm:$0xff]   ;;  %v6481_v14 = vld [vmem:[%s7741_s9 + $0x2d8] sm:$0xff]  }
0x130d   :  { %v4105_v57 = vadd.f32 %v4104_v55, %v3616_v20  ;;  %v4148_v58 = vadd.f32 %v4147_v56, %v7350_v35  ;;  %v4106_v59 = vpop.f32.mrb[55].mxu0  ;;  %v4149_v60 = vpop.f32.mrb[59].mxu1  ;;  %v4164_v1 = vmax.f32 %v4101_v36, 0.0  ;;  %v4166_v2 = vmax.f32 %v4144_v51, 0.0  ;;  %v6460_v35 = vld [vmem:[%s7741_s9 + $0x170] sm:$0xff]   ;;  %v6465_v20 = vld [vmem:[%s7741_s9 + $0x1f8] sm:$0xff]  }
0x130e   :  { %v4107_v62 = vadd.f32 %v4106_v59, %v3620_v21  ;;  %v4150_v63 = vadd.f32 %v4149_v60, %v3628_v46  ;;  %6033 = vmatpush3.bf16.msra.mxu0 %v6454_v47  ;;  %6055 = vmatpush3.bf16.msra.mxu1 %v6455_v48  ;;  %v4165_v6 = vmax.f32 %v4103_v54, 0.0  ;;  %v4167_v7 = vmax.f32 %v4146_v39, 0.0  ;;  %v6466_v21 = vld [vmem:[%s7741_s9 + $0x138] sm:$0xff]   ;;  %v6471_v46 = vld [vmem:[%s7741_s9 + $0x280] sm:$0xff]   ;;  %v6488_v47 = vld [vmem:[%s7741_s9 + $0x268] sm:$0xff]  }
0x130f   :  { %v4180_v3 = vmax.f32 %v4105_v57, 0.0  ;;  %v4182_v4 = vmax.f32 %v4148_v58, 0.0  ;;  %6034 = vmatprep.subr.bf16.mxu0 %v6456_v52  ;;  %6056 = vmatprep.subr.bf16.mxu1 %v6457_v53  ;;  %v6482_v38 = vld [vmem:[%s7741_s9 + $0x218] sm:$0xff]   ;;  %v6486_v43 = vld [vmem:[%s7741_s9 + $0x220] sm:$0xff]   ;;  %v6489_v48 = vld [vmem:[%s7741_s9 + $0x2e8] sm:$0xff]  }
0x1310   :  { %v4181_v8 = vmax.f32 %v4107_v62, 0.0  ;;  %v4183_v10 = vmax.f32 %v4150_v63, 0.0  ;;  %v6483_v12 = vld [vmem:[%s7741_s9 + $0x298] sm:$0xff]   ;;  %v6487_v44 = vld [vmem:[%s7741_s9 + $0x2a0] sm:$0xff]   ;;  %v6490_v36 = vld [vmem:[%s7741_s9 + $0x228] sm:$0xff]  }
0x1311   :  { %v7475_v11 = vpack.c.bf16 %v4180_v3, %v4164_v1  ;;  %v7477_v13 = vpack.c.bf16 %v4182_v4, %v4166_v2  ;;  %v6491_v51 = vld [vmem:[%s7741_s9 + $0x2a8] sm:$0xff]   ;;  %v6492_v37 = vld [vmem:[%s7741_s9 + $0x270] sm:$0xff]   ;;  %v6496_v54 = vld [vmem:[%s7741_s9 + $0x278] sm:$0xff]  }
0x1312   :  { %v7479_v15 = vpack.c.bf16 %v4181_v8, %v4165_v6  ;;  %v7481_v16 = vpack.c.bf16 %v4183_v10, %v4167_v7  ;;  %6035 = vmatpush3.bf16.msra.mxu0 %v6458_v45  ;;  %6057 = vmatpush3.bf16.msra.mxu1 %v6459_v0  ;;  %v6493_v9 = vld [vmem:[%s7741_s9 + $0x2f0] sm:$0xff]   ;;  %v6497_v39 = vld [vmem:[%s7741_s9 + $0x2f8] sm:$0xff]   ;;  %v6500_v57 = vld [vmem:[%s7741_s9 + $0x340] sm:$0xff]  }
0x1313   :  { %6036 = vmatprep.subr.bf16.mxu0 %v6460_v35  ;;  %6058 = vmatprep.subr.bf16.mxu1 %v6461_v5  ;;  %v6494_v52 = vld [vmem:[%s7741_s9 + $0x230] sm:$0xff]   ;;  %v6498_v55 = vld [vmem:[%s7741_s9 + $0x238] sm:$0xff]   ;;  %v6501_v58 = vld [vmem:[%s7741_s9 + $0x3c0] sm:$0xff]  }
0x1314   :  { %v6495_v53 = vld [vmem:[%s7741_s9 + $0x2b0] sm:$0xff]   ;;  %v6499_v56 = vld [vmem:[%s7741_s9 + $0x2b8] sm:$0xff]   ;;  %v6502_v59 = vld [vmem:[%s7741_s9 + $0x300] sm:$0xff]  }
0x1315   :  { %v6503_v60 = vld [vmem:[%s7741_s9 + $0x380] sm:$0xff]   ;;  %v6504_v62 = vld [vmem:[%s7741_s9 + $0x348] sm:$0xff]   ;;  %v6510_v1 = vld [vmem:[%s7741_s9 + $0x310] sm:$0xff]  }
0x1316   :  { %6037 = vmatpush3.bf16.msra.mxu0 %v6462_v17  ;;  %6059 = vmatpush3.bf16.msra.mxu1 %v6463_v18  ;;  %v6505_v63 = vld [vmem:[%s7741_s9 + $0x3c8] sm:$0xff]   ;;  %v6511_v2 = vld [vmem:[%s7741_s9 + $0x390] sm:$0xff]   ;;  %v6512_v3 = vld [vmem:[%s7741_s9 + $0x358] sm:$0xff]  }
0x1317   :  { %6038 = vmatprep.subr.bf16.mxu0 %v6464_v19  ;;  %6060 = vmatprep.subr.bf16.mxu1 %v6465_v20  ;;  %v6506_v45 = vld [vmem:[%s7741_s9 + $0x308] sm:$0xff]   ;;  %v6513_v4 = vld [vmem:[%s7741_s9 + $0x3d8] sm:$0xff]   ;;  %v6516_v6 = vld [vmem:[%s7741_s9 + $0x360] sm:$0xff]  }
0x1318   :  { %v6507_v0 = vld [vmem:[%s7741_s9 + $0x388] sm:$0xff]   ;;  %v6514_v35 = vld [vmem:[%s7741_s9 + $0x318] sm:$0xff]   ;;  %v6517_v7 = vld [vmem:[%s7741_s9 + $0x3e0] sm:$0xff]  }
0x1319   :  { %v6515_v5 = vld [vmem:[%s7741_s9 + $0x398] sm:$0xff]   ;;  %v6518_v8 = vld [vmem:[%s7741_s9 + $0x320] sm:$0xff]   ;;  %v6522_v17 = vld [vmem:[%s7741_s9 + $0x328] sm:$0xff]  }
0x131a   :  { %6039 = vmatpush3.bf16.msra.mxu0 %v6466_v21  ;;  %6061 = vmatpush3.bf16.msra.mxu1 %v6467_v24  ;;  %v6519_v10 = vld [vmem:[%s7741_s9 + $0x3a0] sm:$0xff]   ;;  %v6523_v18 = vld [vmem:[%s7741_s9 + $0x3a8] sm:$0xff]   ;;  %v6524_v19 = vld [vmem:[%s7741_s9 + $0x370] sm:$0xff]  }
0x131b   :  { %6068 = vmatprep.subr.bf16.mxu0 %v6468_v25  ;;  %6090 = vmatprep.subr.bf16.mxu1 %v6469_v26  ;;  %v6525_v20 = vld [vmem:[%s7741_s9 + $0x3f0] sm:$0xff]   ;;  %v6528_v25 = vld [vmem:[%s7741_s9 + $0x378] sm:$0xff]  }
0x131c   :  { %v6526_v21 = vld [vmem:[%s7741_s9 + $0x330] sm:$0xff]   ;;  %v6529_v26 = vld [vmem:[%s7741_s9 + $0x3f8] sm:$0xff]  }
0x131d   :  { %5346 = vmatmul.mubr.bf16.vlgmr.msra.gmra.mrb[60].mxu0 %v7404_v61  ;;  %5387 = vmatmul.mubr.bf16.vlgmr.msra.gmra.mrb[64].mxu1 %v7406_v40  ;;  %v6476_v61 = vld [vmem:[%s7741_s9 + $0x250] sm:$0xff]  }
0x131e   :  { %6069 = vmatpush3.bf16.msra.mxu0 %v6470_v27  ;;  %5427 = vmatprep.mubr.bf16.mxu0 %v7445_v50  ;;  %v6477_v40 = vld [vmem:[%s7741_s9 + $0x2d0] sm:$0xff]   ;;  %v6484_v50 = vld [vmem:[%s7741_s9 + $0x260] sm:$0xff]   ;;  %v6530_v27 = vld [vmem:[%s7741_s9 + $0x338] sm:$0xff]  }
0x131f   :  { %6091 = vmatpush3.bf16.msra.mxu1 %v6471_v46  ;;  %5468 = vmatprep.mubr.bf16.mxu1 %v7447_v42  ;;  %v6485_v42 = vld [vmem:[%s7741_s9 + $0x2e0] sm:$0xff]   ;;  %v6527_v24 = vld [vmem:[%s7741_s9 + $0x3b0] sm:$0xff]   ;;  %v6531_v46 = vld [vmem:[%s7741_s9 + $0x3b8] sm:$0xff]  }
0x1320   :  { %6070 = vmatprep.subr.bf16.mxu0 %v6472_v28  ;;  %6092 = vmatprep.subr.bf16.mxu1 %v6473_v29 }
0x1322   :  { %6071 = vmatpush3.bf16.msra.mxu0 %v6474_v30  ;;  %v5755_v30 = vld [vmem:[%s7742_s10] ss:$0 sm:$0xff] }
0x1323   :  { %6093 = vmatpush3.bf16.msra.mxu1 %v6475_v49  ;;  %6072 = vmatprep.subr.bf16.mxu0 %v6476_v61 }
0x1324   :  { %6094 = vmatprep.subr.bf16.mxu1 %v6477_v40 }
0x1326   :  { %6073 = vmatpush3.bf16.msra.mxu0 %v6478_v31 }
0x1327   :  { %6095 = vmatpush3.bf16.msra.mxu1 %v6479_v32  ;;  %6074 = vmatprep.subr.bf16.mxu0 %v6480_v33 }
0x1328   :  { %6096 = vmatprep.subr.bf16.mxu1 %v6481_v14 }
0x132a   :  { %6075 = vmatpush3.bf16.msra.mxu0 %v6482_v38 }
0x132b   :  { %6097 = vmatpush3.bf16.msra.mxu1 %v6483_v12  ;;  %6076 = vmatprep.subr.bf16.mxu0 %v6484_v50 }
0x132c   :  { %6098 = vmatprep.subr.bf16.mxu1 %v6485_v42 }
0x132e   :  { %6077 = vmatpush3.bf16.msra.mxu0 %v6486_v43 }
0x132f   :  { %6099 = vmatpush3.bf16.msra.mxu1 %v6487_v44  ;;  %6078 = vmatprep.subr.bf16.mxu0 %v6488_v47 }
0x1330   :  { %6100 = vmatprep.subr.bf16.mxu1 %v6489_v48 }
0x1332   :  { %6079 = vmatpush3.bf16.msra.mxu0 %v6490_v36 }
0x1333   :  { %6101 = vmatpush3.bf16.msra.mxu1 %v6491_v51  ;;  %6080 = vmatprep.subr.bf16.mxu0 %v6492_v37 }
0x1334   :  { %6102 = vmatprep.subr.bf16.mxu1 %v6493_v9 }
0x1336   :  { %6081 = vmatpush3.bf16.msra.mxu0 %v6494_v52 }
0x1337   :  { %6103 = vmatpush3.bf16.msra.mxu1 %v6495_v53  ;;  %6082 = vmatprep.subr.bf16.mxu0 %v6496_v54 }
0x1338   :  { %6104 = vmatprep.subr.bf16.mxu1 %v6497_v39 }
0x133a   :  { %6083 = vmatpush3.bf16.msra.mxu0 %v6498_v55 }
0x133b   :  { %6105 = vmatpush3.bf16.msra.mxu1 %v6499_v56  ;;  %6112 = vmatprep.subr.bf16.mxu0 %v6500_v57 }
0x133c   :  { %6134 = vmatprep.subr.bf16.mxu1 %v6501_v58 }
0x133d   :  { %5428 = vmatmul.mubr.bf16.vlgmr.msra.gmra.mrb[64].mxu0 %v7441_v41  ;;  %v6508_v41 = vld [vmem:[%s7741_s9 + $0x350] sm:$0xff]  }
0x133e   :  { %5469 = vmatmul.mubr.bf16.vlgmr.msra.gmra.mrb[68].mxu1 %v7443_v34  ;;  %6113 = vmatpush3.bf16.msra.mxu0 %v6502_v59  ;;  %v6509_v34 = vld [vmem:[%s7741_s9 + $0x3d0] sm:$0xff]  }
0x133f   :  { %5509 = vmatprep.mubr.bf16.mxu0 %v7479_v15  ;;  %6135 = vmatpush3.bf16.msra.mxu1 %v6503_v60  ;;  %v6520_v15 = vld [vmem:[%s7741_s9 + $0x368] sm:$0xff]  }
0x1340   :  { %5550 = vmatprep.mubr.bf16.mxu1 %v7481_v16  ;;  %6114 = vmatprep.subr.bf16.mxu0 %v6504_v62  ;;  %v6521_v16 = vld [vmem:[%s7741_s9 + $0x3e8] sm:$0xff]  }
0x1341   :  { %6136 = vmatprep.subr.bf16.mxu1 %v6505_v63 }
0x1342   :  { %6115 = vmatpush3.bf16.msra.mxu0 %v6506_v45 }
0x1343   :  { %6137 = vmatpush3.bf16.msra.mxu1 %v6507_v0  ;;  %6116 = vmatprep.subr.bf16.mxu0 %v6508_v41 }
0x1344   :  { %6138 = vmatprep.subr.bf16.mxu1 %v6509_v34 }
0x1346   :  { %6117 = vmatpush3.bf16.msra.mxu0 %v6510_v1 }
0x1347   :  { %6139 = vmatpush3.bf16.msra.mxu1 %v6511_v2  ;;  %6118 = vmatprep.subr.bf16.mxu0 %v6512_v3 }
0x1348   :  { %6140 = vmatprep.subr.bf16.mxu1 %v6513_v4 }
0x134a   :  { %6119 = vmatpush3.bf16.msra.mxu0 %v6514_v35 }
0x134b   :  { %6141 = vmatpush3.bf16.msra.mxu1 %v6515_v5  ;;  %6120 = vmatprep.subr.bf16.mxu0 %v6516_v6 }
0x134c   :  { %6142 = vmatprep.subr.bf16.mxu1 %v6517_v7 }
0x134e   :  { %6121 = vmatpush3.bf16.msra.mxu0 %v6518_v8 }
0x134f   :  { %6143 = vmatpush3.bf16.msra.mxu1 %v6519_v10  ;;  %6122 = vmatprep.subr.bf16.mxu0 %v6520_v15 }
0x1350   :  { %6144 = vmatprep.subr.bf16.mxu1 %v6521_v16 }
0x1352   :  { %6123 = vmatpush3.bf16.msra.mxu0 %v6522_v17 }
0x1353   :  { %6145 = vmatpush3.bf16.msra.mxu1 %v6523_v18  ;;  %6124 = vmatprep.subr.bf16.mxu0 %v6524_v19 }
0x1354   :  { %6146 = vmatprep.subr.bf16.mxu1 %v6525_v20 }
0x1356   :  { %6125 = vmatpush3.bf16.msra.mxu0 %v6526_v21 }
0x1357   :  { %6147 = vmatpush3.bf16.msra.mxu1 %v6527_v24  ;;  %6126 = vmatprep.subr.bf16.mxu0 %v6528_v25 }
0x1358   :  { %6148 = vmatprep.subr.bf16.mxu1 %v6529_v26 }
0x135a   :  { %6127 = vmatpush3.bf16.msra.mxu0 %v6530_v27 }
0x135b   :  { %6149 = vmatpush3.bf16.msra.mxu1 %v6531_v46 }
0x135d   :  { %5510 = vmatmul.mubr.bf16.vlgmr.msra.gmra.mrb[68].mxu0 %v7475_v11 }
0x135e   :  { %5551 = vmatmul.mubr.bf16.vlgmr.msra.gmra.mrb[72].mxu1 %v7477_v13 }
0x13d0   :  { %v5996_v28 = vpop.f32.mrb[56].mxu0  ;;  %v6018_v29 = vpop.f32.mrb[60].mxu1 }
0x13d1   :  { %v5997_v49 = vpop.f32.mrb[57].mxu0  ;;  %v6019_v61 = vpop.f32.mrb[61].mxu1 }
0x13d2   :  { %v5998_v40 = vadd.f32 %v5997_v49, %v5996_v28  ;;  %v6020_v31 = vadd.f32 %v6019_v61, %v6018_v29  ;;  %v5999_v32 = vpop.f32.mrb[58].mxu0  ;;  %v6021_v33 = vpop.f32.mrb[62].mxu1 }
0x13d3   :  { %v6000_v14 = vpop.f32.mrb[59].mxu0  ;;  %v6022_v38 = vpop.f32.mrb[63].mxu1 }
0x13d4   :  { %v5266_v12 = vadd.f32 %v5998_v40, %v5755_v30  ;;  %v6001_v50 = vadd.f32 %v6000_v14, %v5999_v32  ;;  %v6023_v42 = vadd.f32 %v6022_v38, %v6021_v33 }
0x13d6   :  { %v5307_v11 = vadd.f32 %v6020_v31, %v5266_v12  ;;  %v5269_v43 = vadd.f32 %v6001_v50, %v5755_v30 }
0x13d8   :  { %v5310_v13 = vadd.f32 %v6023_v42, %v5269_v43 }
0x13f0   :  { %v6040_v44 = vpop.f32.mrb[60].mxu0  ;;  %v6062_v47 = vpop.f32.mrb[64].mxu1 }
0x13f1   :  { %v6041_v48 = vpop.f32.mrb[61].mxu0  ;;  %v6063_v36 = vpop.f32.mrb[65].mxu1 }
0x13f2   :  { %v6042_v51 = vadd.f32 %v6041_v48, %v6040_v44  ;;  %v6064_v37 = vadd.f32 %v6063_v36, %v6062_v47  ;;  %v6043_v9 = vpop.f32.mrb[62].mxu0  ;;  %v6065_v52 = vpop.f32.mrb[66].mxu1 }
0x13f3   :  { %v6044_v53 = vpop.f32.mrb[63].mxu0  ;;  %v6066_v54 = vpop.f32.mrb[67].mxu1 }
0x13f4   :  { %v5348_v39 = vadd.f32 %v6042_v51, %v5307_v11  ;;  %v6045_v55 = vadd.f32 %v6044_v53, %v6043_v9  ;;  %v6067_v56 = vadd.f32 %v6066_v54, %v6065_v52 }
0x13f6   :  { %v5389_v57 = vadd.f32 %v6064_v37, %v5348_v39  ;;  %v5351_v58 = vadd.f32 %v6045_v55, %v5310_v13 }
0x13f8   :  { %v5392_v59 = vadd.f32 %v6067_v56, %v5351_v58  ;;  %v5884_v58 = vld [vmem:[%s7743_s11] ss:$0 sm:$0xff]  ;;  %s6614_s11 = scalar_lea.vmem %s5627_s28, 256 }
0x13f9   :  { %p6615_p0 = scmp.ne.s32.totalorder %s5627_s28, %s6614_s11  ;;  %p6620_p2 = scmp.lt.s32.totalorder %s6614_s11, %s6614_s11 }
0x13fb   :  { %p6621_p3 = por %p6620_p2, %p6619_p1 }
0x13fd   :  { %p6622_p4 = pnand %p6621_p3, %p6615_p0 }
0x1410   :  { %v6084_v60 = vpop.f32.mrb[64].mxu0 }
0x1411   :  { %v6106_v62 = vpop.f32.mrb[68].mxu1  ;;  %v6085_v63 = vpop.f32.mrb[65].mxu0 }
0x1412   :  { %v6086_v45 = vadd.f32 %v6085_v63, %v6084_v60  ;;  %v6107_v0 = vpop.f32.mrb[69].mxu1  ;;  %v6087_v41 = vpop.f32.mrb[66].mxu0 }
0x1413   :  { %v6108_v34 = vadd.f32 %v6107_v0, %v6106_v62  ;;  %v6109_v1 = vpop.f32.mrb[70].mxu1  ;;  %v6088_v2 = vpop.f32.mrb[67].mxu0  ;;  %v5885_v62 = vld [vmem:[%s7744_s12] ss:$0 sm:$0xff] }
0x1414   :  { %v5430_v3 = vadd.f32 %v6086_v45, %v5389_v57  ;;  %v6089_v4 = vadd.f32 %v6088_v2, %v6087_v41  ;;  %v6110_v35 = vpop.f32.mrb[71].mxu1 }
0x1415   :  { %v6111_v5 = vadd.f32 %v6110_v35, %v6109_v1 }
0x1416   :  { %v5471_v6 = vadd.f32 %v6108_v34, %v5430_v3  ;;  %v5433_v7 = vadd.f32 %v6089_v4, %v5392_v59 }
0x1418   :  { %v5474_v8 = vadd.f32 %v6111_v5, %v5433_v7 }
0x1430   :  { %v6128_v10 = vpop.f32.mrb[68].mxu0 }
0x1431   :  { %v6150_v15 = vpop.f32.mrb[72].mxu1  ;;  %v6129_v16 = vpop.f32.mrb[69].mxu0 }
0x1432   :  { %v6130_v17 = vadd.f32 %v6129_v16, %v6128_v10  ;;  %v6151_v18 = vpop.f32.mrb[73].mxu1  ;;  %v6131_v19 = vpop.f32.mrb[70].mxu0 }
0x1433   :  { %v6152_v20 = vadd.f32 %v6151_v18, %v6150_v15  ;;  %v6153_v21 = vpop.f32.mrb[74].mxu1  ;;  %v6132_v24 = vpop.f32.mrb[71].mxu0 }
0x1434   :  { %v5512_v25 = vadd.f32 %v6130_v17, %v5471_v6  ;;  %v6133_v26 = vadd.f32 %v6132_v24, %v6131_v19  ;;  %v6154_v27 = vpop.f32.mrb[75].mxu1 }
0x1435   :  { %v6155_v46 = vadd.f32 %v6154_v27, %v6153_v21 }
0x1436   :  { %v5553_v28 = vadd.f32 %v6152_v20, %v5512_v25  ;;  %v5515_v29 = vadd.f32 %v6133_v26, %v5474_v8 }
0x1438   :  { %v5556_v30 = vadd.f32 %v6155_v46, %v5515_v29  ;;  %v5559_v49 = vadd.f32 %v5553_v28, %v7161_v22 }
0x143a   :  { %v5561_v61 = vsel %vm59_vm0, %v5559_v49, 0.0  ;;  %v5560_v40 = vadd.f32 %v5556_v30, %v7163_v23 }
0x143b   :  { %5562 = vadd.xlane.f32.xlu1 %v5561_v61 }
0x143c   :  { %v5564_v31 = vsel %vm59_vm0, %v5560_v40, 0.0 }
0x143d   :  { %5565 = vadd.xlane.f32.xlu0 %v5564_v31 }
0x14c8   :  { %v5563_v32 = vpop.xlane.xlu1 %5562 }
0x14c9   :  { %v5567_v33 = vmul.f32 0.03125, %v5563_v32 }
0x14ca   :  { %v5566_v14 = vpop.xlane.xlu0 %5565 }
0x14cb   :  { %v5569_v38 = vsub.f32 %v5559_v49, %v5567_v33  ;;  %v5568_v12 = vmul.f32 0.03125, %v5566_v14 }
0x14cd   :  { %v5570_v50 = vsub.f32 %v5560_v40, %v5568_v12  ;;  %v5571_v42 = vmul.f32 %v5569_v38, %v5569_v38  ;;  %v5606_v59 = vmul.f32 %v5884_v58, %v5569_v38 }
0x14cf   :  { %v5573_v11 = vsel %vm59_vm0, %v5571_v42, 0.0  ;;  %v5572_v43 = vmul.f32 %v5570_v50, %v5570_v50  ;;  %v5607_v45 = vmul.f32 %v5884_v58, %v5570_v50 }
0x14d0   :  { %5574 = vadd.xlane.f32.xlu1 %v5573_v11 }
0x14d1   :  { %v5576_v22 = vsel %vm59_vm0, %v5572_v43, 0.0 }
0x14d2   :  { %5577 = vadd.xlane.f32.xlu0 %v5576_v22 }
0x155d   :  { %v5575_v13 = vpop.xlane.xlu1 %5574 }
0x155e   :  { %v5579_v23 = vmul.f32 0.032258064, %v5575_v13 }
0x155f   :  { %v5578_v44 = vpop.xlane.xlu0 %5577 }
0x1560   :  { %6604 = vrsqrt.f32 %v5579_v23  ;;  %v5580_v47 = vmul.f32 0.032258064, %v5578_v44  ;;  %vm5583_vm9 = vcmp.eq.f32.partialorder %v5579_v23, inf  ;;  %v5586_v51 = vand.u32 2147483648, %v5579_v23 }
0x1561   :  { %vm5585_vm10 = vcmp.eq.f32.partialorder %v5579_v23, 0.0 }
0x1562   :  { %6606 = vrsqrt.f32 %v5580_v47  ;;  %vm5590_vm11 = vcmp.eq.f32.partialorder %v5580_v47, inf  ;;  %v5593_v39 = vand.u32 2147483648, %v5580_v47  ;;  %vm5592_vm12 = vcmp.eq.f32.partialorder %v5580_v47, 0.0 }
0x156a   :  { %v6605_v48 = vpop.eup %6604 }
0x156b   :  { %v5582_v36 = vmul.f32 %v6605_v48, %v5579_v23 }
0x156c   :  { %v6607_v37 = vpop.eup %6606 }
0x156d   :  { %v5584_v9 = vsel %vm5583_vm9, %v5579_v23, %v5582_v36  ;;  %v5589_v53 = vmul.f32 %v6607_v37, %v5580_v47 }
0x156e   :  { %v5587_v52 = vsel %vm5585_vm10, %v5586_v51, %v5584_v9 }
0x156f   :  { %v5595_v54 = vadd.f32 1e-06, %v5587_v52  ;;  %v5591_v55 = vsel %vm5590_vm11, %v5580_v47, %v5589_v53 }
0x1570   :  { %v5594_v56 = vsel %vm5592_vm12, %v5593_v39, %v5591_v55 }
0x1571   :  { %6608 = vrcp.f32 %v5595_v54  ;;  %v5596_v57 = vadd.f32 1e-06, %v5594_v56 }
0x1573   :  { %6610 = vrcp.f32 %v5596_v57 }
0x157b   :  { %v6609_v60 = vpop.eup %6608 }
0x157c   :  { %v5608_v63 = vmul.f32 %v6609_v60, %v5606_v59 }
0x157d   :  { %v6611_v0 = vpop.eup %6610 }
0x157e   :  { %v5617_v41 = vadd.f32 %v5885_v62, %v5608_v63  ;;  %v5609_v34 = vmul.f32 %v6611_v0, %v5607_v45 }
0x1580   :  { %5619 = vst.msk [vmem:[#allocation2] sm:$0xff] %vm59_vm0, %v5617_v41  ;;  %v5618_v1 = vadd.f32 %v5885_v62, %v5609_v34 }
0x1582   :  { %5620 = vst.msk [vmem:[#allocation2 + $0x8] sm:$0xff] %vm59_vm0, %v5618_v1 }
0x1583   :  { %6625 = shalt.err (!%p6622_p4)
}
0x1584   :  { %s6626_s30 = scalar_lea.hbm %s7745_s13, 256 }
0x1585   :  { %p6627_p5 = scmp.ne.s32.totalorder %s7745_s13, %s6626_s30  ;;  %p6630_p6 = scmp.lt.u32.totalorder %s6626_s30, %s7745_s13 }
0x1587   :  { %p6632_p7 = pnand %p6630_p6, %p6627_p5 }
0x1589   :  { %6635 = shalt.err (!%p6632_p7)
}
0x158a   :  { %s6665_s17 = smov 128   ;;  %s6666_s18 = smov 8  }
0x158b   :  { %5632 = dma.vmem_to_hbm [thread:$0]  %s5627_s28, 256, %s7745_s13, [#allocation3], %s6665_s17, %s6665_s17, %s6666_s18  }
0x158c   :  { %6636 = dma.done.wait [#allocation3], 256  }
0x158d   :  { %6637 = vsyncadd [#allocation3], 4294967040 }
0x158e   :  { %5636 = vsyncpa [#allocation3], 1 }

</bundles_post_ra>
